<compile_context>
chip_gen: v7x
topology: tpu7x:2x2x1
jax: 0.10.0
libtpu: 0.0.40
codegen_flags: <defaults>
</compile_context>

<pallas_src>
import numpy as np

import jax
import jax.numpy as jnp
from jax.experimental import pallas as pl
from jax.experimental.pallas import tpu as pltpu

_HP = jax.lax.Precision.HIGHEST  # exact f32 matmuls (tiny shapes -> free)


# ----------------------------------------------------------------------------
# Fused CA kernel (one image per grid step)
# ----------------------------------------------------------------------------
def _ca_kernel(x_ref, pool_ref, eh_ref, ew_ref,
               w1_ref, b1_ref, w2_ref, b2_ref, w3_ref, b3_ref, o_ref):
    f32 = jnp.float32
    x = x_ref[0].astype(f32)                                      # (C, S), S=H*W

    # Coordinate average pooling + concat as ONE matmul with a constant
    # selector:  pool[s, h]   = 1/W  if s//W == h   (mean over W  -> x_h)
    #            pool[s, H+w] = 1/H  if s%W  == w   (mean over H  -> x_w)
    xhw = jnp.dot(x, pool_ref[...], precision=_HP,
                  preferred_element_type=f32)                     # (C, H+W)

    # conv1 (1x1) + folded BN(eval) + ReLU on the concatenated slab, exactly
    # mirroring the PyTorch cat([x_h, x_w], dim=2) path.
    yhw = jnp.maximum(jnp.dot(w1_ref[...], xhw, precision=_HP,
                              preferred_element_type=f32) + b1_ref[...], 0.0)  # (T, H+W)

    # conv2 / conv3 (1x1 + bias) + sigmoid applied to the full (T, H+W) slab;
    # the zero-padded expanders below pick out only the valid H (resp. W)
    # columns, so no sub-128 lane slicing / relayout is needed.
    ah = jax.nn.sigmoid(jnp.dot(w2_ref[...], yhw, precision=_HP,
                                preferred_element_type=f32) + b2_ref[...])     # (Co, H+W)
    aw = jax.nn.sigmoid(jnp.dot(w3_ref[...], yhw, precision=_HP,
                                preferred_element_type=f32) + b3_ref[...])     # (Co, H+W)

    # Broadcast the row/column attention back onto the flattened (h, w) grid:
    #   eh[h,   s] = 1 if s//W == h else 0   (rows H..H+W-1 are all-zero)
    #   ew[H+w, s] = 1 if s%W  == w else 0   (rows 0..H-1    are all-zero)
    att = (jnp.dot(ah, eh_ref[...], precision=_HP, preferred_element_type=f32) *
           jnp.dot(aw, ew_ref[...], precision=_HP, preferred_element_type=f32))  # (Co, S)

    o_ref[0] = (x * att).astype(o_ref.dtype)


def _selectors(H, W):
    """Constant pooling / broadcast selector matrices (built on host)."""
    S = H * W
    s = np.arange(S)
    hh = s // W
    ww = s % W
    pool = np.zeros((S, H + W), np.float32)
    pool[s, hh] = 1.0 / W                       # mean over W  -> x_h columns
    pool[s, H + ww] = 1.0 / H                   # mean over H  -> x_w columns
    eh = np.zeros((H + W, S), np.float32)
    eh[hh, s] = 1.0                             # expand (Co, H) -> (Co, S)
    ew = np.zeros((H + W, S), np.float32)
    ew[H + ww, s] = 1.0                         # expand (Co, W) -> (Co, S)
    return jnp.asarray(pool), jnp.asarray(eh), jnp.asarray(ew)


def ca_forward(x_nchw, params):
    """Pallas CA forward.  x: (N, C, H, W) NCHW, params: folded weights."""
    N, C, H, W = x_nchw.shape
    S = H * W
    w1, b1 = params["w1"], params["b1"]          # (T, C),  (T, 1)   BN folded
    w2, b2 = params["w2"], params["b2"]          # (Co, T), (Co, 1)
    w3, b3 = params["w3"], params["b3"]          # (Co, T), (Co, 1)
    T = w1.shape[0]
    Co = w2.shape[0]
    assert Co in (1, C), "final gating broadcast needs out_channels == in_channels (or 1)"

    pool, eh, ew = _selectors(H, W)
    x2 = x_nchw.reshape(N, C, S)                 # free row-major metadata reshape

    out2 = pl.pallas_call(
        _ca_kernel,
        out_shape=jax.ShapeDtypeStruct((N, C, S), x_nchw.dtype),
        grid_spec=pltpu.PrefetchScalarGridSpec(
            num_scalar_prefetch=0,
            grid=(N,),
            in_specs=[
                pl.BlockSpec((1, C, S), lambda n: (n, 0, 0)),       # x (per image)
                pl.BlockSpec((S, H + W), lambda n: (0, 0)),         # pool+concat selector
                pl.BlockSpec((H + W, S), lambda n: (0, 0)),         # h-broadcast expander
                pl.BlockSpec((H + W, S), lambda n: (0, 0)),         # w-broadcast expander
                pl.BlockSpec((T, C), lambda n: (0, 0)),             # conv1 (BN-folded)
                pl.BlockSpec((T, 1), lambda n: (0, 0)),
                pl.BlockSpec((Co, T), lambda n: (0, 0)),            # conv2
                pl.BlockSpec((Co, 1), lambda n: (0, 0)),
                pl.BlockSpec((Co, T), lambda n: (0, 0)),            # conv3
                pl.BlockSpec((Co, 1), lambda n: (0, 0)),
            ],
            out_specs=pl.BlockSpec((1, C, S), lambda n: (n, 0, 0)),
        ),
        compiler_params=pltpu.CompilerParams(
            dimension_semantics=("parallel",),
            vmem_limit_bytes=64 * 1024 * 1024,
        ),
    )(x2, pool, eh, ew, w1, b1, w2, b2, w3, b3)

    return out2.reshape(N, C, H, W)


# ----------------------------------------------------------------------------
# Parameters (raw, PyTorch-style) + BN folding for the kernel
# ----------------------------------------------------------------------------
def init_ca_params(key, in_channels, out_channels, reduction=32, eps=1e-5):
    t = max(8, in_channels // reduction)
    ks = jax.random.split(key, 10)
    w1 = 0.3 * jax.random.normal(ks[0], (t, in_channels), jnp.float32)
    b1 = 0.1 * jax.random.normal(ks[1], (t,), jnp.float32)
    gamma = jax.random.uniform(ks[2], (t,), jnp.float32, 0.5, 1.5)
    beta = 0.1 * jax.random.normal(ks[3], (t,), jnp.float32)
    mean = 0.1 * jax.random.normal(ks[4], (t,), jnp.float32)
    var = jax.random.uniform(ks[5], (t,), jnp.float32, 0.5, 1.5)
    w2 = 0.3 * jax.random.normal(ks[6], (out_channels, t), jnp.float32)
    b2 = 0.1 * jax.random.normal(ks[7], (out_channels,), jnp.float32)
    w3 = 0.3 * jax.random.normal(ks[8], (out_channels, t), jnp.float32)
    b3 = 0.1 * jax.random.normal(ks[9], (out_channels,), jnp.float32)
    raw = {"w1": w1, "b1": b1, "gamma": gamma, "beta": beta, "mean": mean,
           "var": var, "w2": w2, "b2": b2, "w3": w3, "b3": b3, "eps": eps}

    # Fold BatchNorm (inference mode, running stats) + conv1 bias into conv1.
    scale = gamma / jnp.sqrt(var + eps)
    folded = {"w1": w1 * scale[:, None],
              "b1": (scale * (b1 - mean) + beta)[:, None],
              "w2": w2, "b2": b2[:, None],
              "w3": w3, "b3": b3[:, None]}
    return raw, folded


# ----------------------------------------------------------------------------
# Pure-JAX reference mirroring the PyTorch module (BN in eval mode)
# ----------------------------------------------------------------------------
def ca_reference(x, raw):
    N, C, H, W = x.shape
    eps = raw["eps"]

    def conv1x1(z, w, b):      # z: (N, Cin, A, B), w: (Cout, Cin), b: (Cout,)
        y = jnp.einsum("nchw,oc->nohw", z, w, precision=_HP)
        return y + b[None, :, None, None]

    x_h = jnp.mean(x, axis=3, keepdims=True)                  # (N,C,H,1) pool over W
    x_w = jnp.mean(x, axis=2, keepdims=True)                  # (N,C,1,W) pool over H
    x_w = jnp.transpose(x_w, (0, 1, 3, 2))                    # (N,C,W,1)
    x_cat = jnp.concatenate([x_h, x_w], axis=2)               # (N,C,H+W,1)

    y = conv1x1(x_cat, raw["w1"], raw["b1"])
    scale = raw["gamma"] / jnp.sqrt(raw["var"] + eps)
    y = (y - raw["mean"][None, :, None, None]) * scale[None, :, None, None] \
        + raw["beta"][None, :, None, None]
    y = jnp.maximum(y, 0.0)                                   # (N,T,H+W,1)

    yh = y[:, :, :H, :]                                       # (N,T,H,1)
    yw = jnp.transpose(y[:, :, H:, :], (0, 1, 3, 2))          # (N,T,1,W)
    out_h = jax.nn.sigmoid(conv1x1(yh, raw["w2"], raw["b2"])) # (N,Co,H,1)
    out_w = jax.nn.sigmoid(conv1x1(yw, raw["w3"], raw["b3"])) # (N,Co,1,W)
    return x * out_w * out_h


if __name__ == "__main__":
    key = jax.random.PRNGKey(0)
    kx, kp = jax.random.split(key)

    N, C, H, W = 2, 4, 16, 16
    x = jax.random.normal(kx, (N, C, H, W), jnp.float32)
    raw, folded = init_ca_params(kp, C, C, reduction=32)

    out = jax.block_until_ready(ca_forward(x, folded))
    ref = jax.block_until_ready(ca_reference(x, raw))

    assert out.shape == (N, C, H, W), out.shape
    assert bool(jnp.allclose(out, ref, atol=1e-4, rtol=1e-4)), \
        float(jnp.max(jnp.abs(out - ref)))
    print("KERNEL_OK")
</pallas_src>

<mosaic_0001>
module attributes {stable_mosaic.version = 11 : i64} {
  func.func @_ca_kernel(%arg0: i32, %arg1: memref<1x4x256xf32, #tpu.memory_space<vmem>>, %arg2: memref<256x32xf32, #tpu.memory_space<vmem>>, %arg3: memref<32x256xf32, #tpu.memory_space<vmem>>, %arg4: memref<32x256xf32, #tpu.memory_space<vmem>>, %arg5: memref<8x4xf32, #tpu.memory_space<vmem>>, %arg6: memref<8x1xf32, #tpu.memory_space<vmem>>, %arg7: memref<4x8xf32, #tpu.memory_space<vmem>>, %arg8: memref<4x1xf32, #tpu.memory_space<vmem>>, %arg9: memref<4x8xf32, #tpu.memory_space<vmem>>, %arg10: memref<4x1xf32, #tpu.memory_space<vmem>>, %arg11: memref<1x4x256xf32, #tpu.memory_space<vmem>>) attributes {dimension_semantics = [#tpu.dimension_semantics<parallel>], iteration_bounds = array<i64: 2>, scalar_prefetch = 0 : i64, scratch_operands = 0 : i64, tpu.core_type = #tpu.core_type<tc>, window_params = [{transform_indices = @transform_0, window_bounds = array<i64: 1, 4, 256>}, {pipeline_mode = #tpu.pipeline_mode<synchronous>, transform_indices = @transform_1, window_bounds = array<i64: 256, 32>}, {pipeline_mode = #tpu.pipeline_mode<synchronous>, transform_indices = @transform_2, window_bounds = array<i64: 32, 256>}, {pipeline_mode = #tpu.pipeline_mode<synchronous>, transform_indices = @transform_3, window_bounds = array<i64: 32, 256>}, {pipeline_mode = #tpu.pipeline_mode<synchronous>, transform_indices = @transform_4, window_bounds = array<i64: 8, 4>}, {pipeline_mode = #tpu.pipeline_mode<synchronous>, transform_indices = @transform_5, window_bounds = array<i64: 8, 1>}, {pipeline_mode = #tpu.pipeline_mode<synchronous>, transform_indices = @transform_6, window_bounds = array<i64: 4, 8>}, {pipeline_mode = #tpu.pipeline_mode<synchronous>, transform_indices = @transform_7, window_bounds = array<i64: 4, 1>}, {pipeline_mode = #tpu.pipeline_mode<synchronous>, transform_indices = @transform_8, window_bounds = array<i64: 4, 8>}, {pipeline_mode = #tpu.pipeline_mode<synchronous>, transform_indices = @transform_9, window_bounds = array<i64: 4, 1>}, {transform_indices = @transform_10, window_bounds = array<i64: 1, 4, 256>}]} {
    %c0 = arith.constant 0 : index
    %c0_0 = arith.constant 0 : index
    %c0_1 = arith.constant 0 : index
    %0 = vector.load %arg1[%c0, %c0_0, %c0_1] : memref<1x4x256xf32, #tpu.memory_space<vmem>>, vector<1x4x256xf32>
    %1 = vector.shape_cast %0 : vector<1x4x256xf32> to vector<4x256xf32>
    %c0_2 = arith.constant 0 : index
    %c0_3 = arith.constant 0 : index
    %2 = vector.load %arg2[%c0_2, %c0_3] : memref<256x32xf32, #tpu.memory_space<vmem>>, vector<256x32xf32>
    %cst = arith.constant dense<0.000000e+00> : vector<4x32xf32>
    %3 = tpu.matmul %1, %2, %cst {dimension_numbers = #tpu.dot_dimension_numbers<[1], [0], [0], [1], [0, 0, 1, 1], [], []>, precision = #tpu.contract_precision<fp32>} : vector<4x256xf32>, vector<256x32xf32>, vector<4x32xf32> -> vector<4x32xf32>
    %c0_4 = arith.constant 0 : index
    %c0_5 = arith.constant 0 : index
    %4 = vector.load %arg5[%c0_4, %c0_5] : memref<8x4xf32, #tpu.memory_space<vmem>>, vector<8x4xf32>
    %cst_6 = arith.constant dense<0.000000e+00> : vector<8x32xf32>
    %5 = tpu.matmul %4, %3, %cst_6 {dimension_numbers = #tpu.dot_dimension_numbers<[1], [0], [0], [1], [0, 0, 1, 1], [], []>, precision = #tpu.contract_precision<fp32>} : vector<8x4xf32>, vector<4x32xf32>, vector<8x32xf32> -> vector<8x32xf32>
    %c0_7 = arith.constant 0 : index
    %c0_8 = arith.constant 0 : index
    %6 = vector.load %arg6[%c0_7, %c0_8] : memref<8x1xf32, #tpu.memory_space<vmem>>, vector<8x1xf32>
    %7 = vector.broadcast %6 : vector<8x1xf32> to vector<8x32xf32>
    %8 = arith.addf %5, %7 : vector<8x32xf32>
    %cst_9 = arith.constant 0.000000e+00 : f32
    %9 = vector.broadcast %cst_9 : f32 to vector<8x32xf32>
    %10 = arith.maximumf %8, %9 : vector<8x32xf32>
    %c0_10 = arith.constant 0 : index
    %c0_11 = arith.constant 0 : index
    %11 = vector.load %arg7[%c0_10, %c0_11] : memref<4x8xf32, #tpu.memory_space<vmem>>, vector<4x8xf32>
    %cst_12 = arith.constant dense<0.000000e+00> : vector<4x32xf32>
    %12 = tpu.matmul %11, %10, %cst_12 {dimension_numbers = #tpu.dot_dimension_numbers<[1], [0], [0], [1], [0, 0, 1, 1], [], []>, precision = #tpu.contract_precision<fp32>} : vector<4x8xf32>, vector<8x32xf32>, vector<4x32xf32> -> vector<4x32xf32>
    %c0_13 = arith.constant 0 : index
    %c0_14 = arith.constant 0 : index
    %13 = vector.load %arg8[%c0_13, %c0_14] : memref<4x1xf32, #tpu.memory_space<vmem>>, vector<4x1xf32>
    %14 = vector.broadcast %13 : vector<4x1xf32> to vector<4x32xf32>
    %15 = arith.addf %12, %14 : vector<4x32xf32>
    %16 = arith.negf %15 : vector<4x32xf32>
    %17 = math.exp %16 : vector<4x32xf32>
    %cst_15 = arith.constant 1.000000e+00 : f32
    %18 = vector.broadcast %cst_15 : f32 to vector<4x32xf32>
    %19 = arith.addf %18, %17 : vector<4x32xf32>
    %20 = arith.divf %18, %19 : vector<4x32xf32>
    %c0_16 = arith.constant 0 : index
    %c0_17 = arith.constant 0 : index
    %21 = vector.load %arg9[%c0_16, %c0_17] : memref<4x8xf32, #tpu.memory_space<vmem>>, vector<4x8xf32>
    %cst_18 = arith.constant dense<0.000000e+00> : vector<4x32xf32>
    %22 = tpu.matmul %21, %10, %cst_18 {dimension_numbers = #tpu.dot_dimension_numbers<[1], [0], [0], [1], [0, 0, 1, 1], [], []>, precision = #tpu.contract_precision<fp32>} : vector<4x8xf32>, vector<8x32xf32>, vector<4x32xf32> -> vector<4x32xf32>
    %c0_19 = arith.constant 0 : index
    %c0_20 = arith.constant 0 : index
    %23 = vector.load %arg10[%c0_19, %c0_20] : memref<4x1xf32, #tpu.memory_space<vmem>>, vector<4x1xf32>
    %24 = vector.broadcast %23 : vector<4x1xf32> to vector<4x32xf32>
    %25 = arith.addf %22, %24 : vector<4x32xf32>
    %26 = arith.negf %25 : vector<4x32xf32>
    %27 = math.exp %26 : vector<4x32xf32>
    %cst_21 = arith.constant 1.000000e+00 : f32
    %28 = vector.broadcast %cst_21 : f32 to vector<4x32xf32>
    %29 = arith.addf %28, %27 : vector<4x32xf32>
    %30 = arith.divf %28, %29 : vector<4x32xf32>
    %c0_22 = arith.constant 0 : index
    %c0_23 = arith.constant 0 : index
    %31 = vector.load %arg3[%c0_22, %c0_23] : memref<32x256xf32, #tpu.memory_space<vmem>>, vector<32x256xf32>
    %cst_24 = arith.constant dense<0.000000e+00> : vector<4x256xf32>
    %32 = tpu.matmul %20, %31, %cst_24 {dimension_numbers = #tpu.dot_dimension_numbers<[1], [0], [0], [1], [0, 0, 1, 1], [], []>, precision = #tpu.contract_precision<fp32>} : vector<4x32xf32>, vector<32x256xf32>, vector<4x256xf32> -> vector<4x256xf32>
    %c0_25 = arith.constant 0 : index
    %c0_26 = arith.constant 0 : index
    %33 = vector.load %arg4[%c0_25, %c0_26] : memref<32x256xf32, #tpu.memory_space<vmem>>, vector<32x256xf32>
    %cst_27 = arith.constant dense<0.000000e+00> : vector<4x256xf32>
    %34 = tpu.matmul %30, %33, %cst_27 {dimension_numbers = #tpu.dot_dimension_numbers<[1], [0], [0], [1], [0, 0, 1, 1], [], []>, precision = #tpu.contract_precision<fp32>} : vector<4x32xf32>, vector<32x256xf32>, vector<4x256xf32> -> vector<4x256xf32>
    %35 = arith.mulf %32, %34 : vector<4x256xf32>
    %36 = arith.mulf %1, %35 : vector<4x256xf32>
    %c0_28 = arith.constant 0 : index
    %c0_29 = arith.constant 0 : index
    %c0_30 = arith.constant 0 : index
    %37 = vector.load %arg11[%c0_28, %c0_29, %c0_30] : memref<1x4x256xf32, #tpu.memory_space<vmem>>, vector<1x4x256xf32>
    %38 = vector.shape_cast %37 : vector<1x4x256xf32> to vector<4x256xf32>
    %39 = vector.shape_cast %36 : vector<4x256xf32> to vector<1x4x256xf32>
    tpu.vector_store %arg11[%c0_28, %c0_29, %c0_30], %39 {strides = array<i32>} : memref<1x4x256xf32, #tpu.memory_space<vmem>>, vector<1x4x256xf32>,
    return
  }
  func.func @transform_0(%arg0: i32) -> (i32, i32, i32) {
    %c0_i32 = arith.constant 0 : i32
    %c0_i32_0 = arith.constant 0 : i32
    %c0_i32_1 = arith.constant 0 : i32
    return %arg0, %c0_i32, %c0_i32_0 : i32, i32, i32
  }
  func.func @transform_1(%arg0: i32) -> (i32, i32) {
    %c0_i32 = arith.constant 0 : i32
    %c0_i32_0 = arith.constant 0 : i32
    %c0_i32_1 = arith.constant 0 : i32
    return %c0_i32, %c0_i32_0 : i32, i32
  }
  func.func @transform_2(%arg0: i32) -> (i32, i32) {
    %c0_i32 = arith.constant 0 : i32
    %c0_i32_0 = arith.constant 0 : i32
    %c0_i32_1 = arith.constant 0 : i32
    return %c0_i32, %c0_i32_0 : i32, i32
  }
  func.func @transform_3(%arg0: i32) -> (i32, i32) {
    %c0_i32 = arith.constant 0 : i32
    %c0_i32_0 = arith.constant 0 : i32
    %c0_i32_1 = arith.constant 0 : i32
    return %c0_i32, %c0_i32_0 : i32, i32
  }
  func.func @transform_4(%arg0: i32) -> (i32, i32) {
    %c0_i32 = arith.constant 0 : i32
    %c0_i32_0 = arith.constant 0 : i32
    %c0_i32_1 = arith.constant 0 : i32
    return %c0_i32, %c0_i32_0 : i32, i32
  }
  func.func @transform_5(%arg0: i32) -> (i32, i32) {
    %c0_i32 = arith.constant 0 : i32
    %c0_i32_0 = arith.constant 0 : i32
    %c0_i32_1 = arith.constant 0 : i32
    return %c0_i32, %c0_i32_0 : i32, i32
  }
  func.func @transform_6(%arg0: i32) -> (i32, i32) {
    %c0_i32 = arith.constant 0 : i32
    %c0_i32_0 = arith.constant 0 : i32
    %c0_i32_1 = arith.constant 0 : i32
    return %c0_i32, %c0_i32_0 : i32, i32
  }
  func.func @transform_7(%arg0: i32) -> (i32, i32) {
    %c0_i32 = arith.constant 0 : i32
    %c0_i32_0 = arith.constant 0 : i32
    %c0_i32_1 = arith.constant 0 : i32
    return %c0_i32, %c0_i32_0 : i32, i32
  }
  func.func @transform_8(%arg0: i32) -> (i32, i32) {
    %c0_i32 = arith.constant 0 : i32
    %c0_i32_0 = arith.constant 0 : i32
    %c0_i32_1 = arith.constant 0 : i32
    return %c0_i32, %c0_i32_0 : i32, i32
  }
  func.func @transform_9(%arg0: i32) -> (i32, i32) {
    %c0_i32 = arith.constant 0 : i32
    %c0_i32_0 = arith.constant 0 : i32
    %c0_i32_1 = arith.constant 0 : i32
    return %c0_i32, %c0_i32_0 : i32, i32
  }
  func.func @transform_10(%arg0: i32) -> (i32, i32, i32) {
    %c0_i32 = arith.constant 0 : i32
    %c0_i32_0 = arith.constant 0 : i32
    %c0_i32_1 = arith.constant 0 : i32
    return %arg0, %c0_i32, %c0_i32_0 : i32, i32, i32
  }
}

</mosaic_0001>

<bundles_post_ra>
// kernel: tpu_custom_call.1
= control target key start
LH: loop header
LB: loop body
LE: loop exit
PB: predicated region body
PF: predicated region fallthrough
CT: control target
= control target key end

     0   :  { %s6477_s0 = inlined_call_operand.hbm [shape: f32[2,4,256], index: 0, kind: input, shape index: {}]   ;;  %s6478_s1 = inlined_call_operand.hbm [shape: f32[256,32], index: 1, kind: input, shape index: {}]   ;;  %s6479_s2 = inlined_call_operand.hbm [shape: f32[32,256], index: 2, kind: input, shape index: {}]   ;;  %s6480_s3 = inlined_call_operand.hbm [shape: f32[32,256], index: 3, kind: input, shape index: {}]   ;;  %s6481_s4 = inlined_call_operand.hbm [shape: f32[8,4], index: 4, kind: input, shape index: {}]   ;;  %s6482_s5 = inlined_call_operand.hbm [shape: f32[8,1], index: 5, kind: input, shape index: {}]   ;;  %s6483_s6 = inlined_call_operand.hbm [shape: f32[4,8], index: 6, kind: input, shape index: {}]   ;;  %s6484_s7 = inlined_call_operand.hbm [shape: f32[4,1], index: 7, kind: input, shape index: {}]   ;;  %s6485_s8 = inlined_call_operand.hbm [shape: f32[4,8], index: 8, kind: input, shape index: {}]   ;;  %s6486_s9 = inlined_call_operand.hbm [shape: f32[4,1], index: 9, kind: input, shape index: {}]   ;;  %s6487_s10 = inlined_call_operand.hbm [shape: f32[2,4,256], index: 10, kind: output, shape index: {}]  }
   0x1   :  { %6543 = sst [smem:[#allocation34_spill]] %s6478_s1 }
   0x2   :  { %6544 = sst [smem:[#allocation35_spill]] %s6487_s10 }
   0x3   :  { %15 = vsyncpa [#allocation3], 0 }
   0x4   :  { %17 = vsyncpa [#allocation3 + $0x1], 0 }
   0x5   :  { %18 = vsyncpa [#allocation6], 0 }
   0x6   :  { %19 = vsyncpa [#allocation9], 0 }
   0x7   :  { %20 = vsyncpa [#allocation12], 0 }
   0x8   :  { %21 = vsyncpa [#allocation15], 0 }
   0x9   :  { %22 = vsyncpa [#allocation18], 0 }
   0xa   :  { %23 = vsyncpa [#allocation4], 0 }
   0xb   :  { %25 = vsyncpa [#allocation4 + $0x1], 0  ;;  %s5379_s13 = smov 0   ;;  %s5381_s14 = smov 0  }
   0xc   :  { %s5383_s15 = smov 0   ;;  %s5385_s16 = smov 0  }
   0xd LB: > { %s5306_s17 = smov [#allocation5]   ;;  %s5400_s19 = sadd.s32 4294967295, %s5304_s16   ;;  %s5304_s16 = sphi %s5385_s16, %s6626_s16   ;;  %s5300_s15 = sphi %s5383_s15, %s6625_s15   ;;  %s5296_s14 = sphi %s5381_s14, %s6624_s14   ;;  %s5292_s13 = sphi %s5379_s13, %s6623_s13  }
   0xe   : > { %s289_s18 = sshll.u32 %s5306_s17, 4  ;;  %p4069_p0 = scmp.ge.s32.totalorder %s5304_s16, 1  ;;  %s5405_s18 = int_to_ptr.vmem [resolvable:$true] %s289_s18 }
   0xf   : > { %p6490_p1 = scmp.eq.s32.totalorder %s5400_s19, 0  ;;  %p277_p2 = scmp.lt.s32.totalorder %s5304_s16, 3 }
  0x10   : > { %s5307_s22 = smov [#allocation8]   ;;  %s5308_s24 = smov [#allocation11]  }
  0x11   : > { %p5407_p3 = pnand %p4069_p0, %p277_p2  ;;  %s315_s23 = sshll.u32 %s5307_s22, 4  ;;  %s5420_s23 = int_to_ptr.vmem [resolvable:$true] %s315_s23 }
  0x12   : > { %s5422_s25 = sshll.u32 %s5308_s24, 4  ;;  %s6548_s1 = sld [smem:[#allocation34_spill]]  ;;  %s341_s25 = int_to_ptr.vmem [resolvable:$true] %s5422_s25 }
  0x13   : > { %s6545_s20 = scalar_select %p5407_p3, 1, 0 }
  0x14   : > { %p4820_p5 = pneg %p5407_p3 }
  0x15   : > { %6546 = sst [smem:[#allocation27_spill]] %s6545_s20 }
  0x16   : > { %p5416_p6 = pnand %p4820_p5, %p6490_p1 }
  0x18   : > { %s4936_s28 = scalar_lea.hbm %s6548_s1, 4096  ;;  %p5432_p8 = pneg %p5416_p6 }
  0x19   : > { %p4937_p7 = scmp.ne.s32.totalorder %s6548_s1, %s4936_s28  ;;  %p4943_p11 = scmp.lt.u32.totalorder %s4936_s28, %s6548_s1 }
  0x1b   : > { %p4939_p9 = pnand %p5432_p8, %p4937_p7 }
  0x1d   : > { %p4940_p10 = pneg %p4939_p9 }
  0x1f   : > { %p4945_p12 = pnand %p4943_p11, %p4940_p10 }
  0x21   : > { %4948 = shalt.err (!%p4945_p12)
}
  0x22   : > { %s4949_s22 = scalar_lea.vmem %s5405_s18, 4096  ;;  %p4957_p5 = scmp.lt.s32.totalorder %s5405_s18, %s5405_s18 }
  0x23   : > { %p4950_p13 = scmp.ne.s32.totalorder %s5405_s18, %s4949_s22  ;;  %p4958_p4 = scmp.lt.s32.totalorder %s4949_s22, %s4949_s22 }
  0x25   : > { %p4952_p0 = pnand %p4950_p13, %p5432_p8  ;;  %p4959_p7 = por %p4958_p4, %p4957_p5 }
  0x27   : > { %p4953_p2 = pneg %p4952_p0 }
  0x29   : > { %p4960_p9 = pnand %p4959_p7, %p4953_p2 }
  0x2b   : > { %4963 = shalt.err (!%p4960_p9)
}
  0x2c   : > { %s5309_s24 = smov 128   ;;  %s5310_s26 = smov 8  }
  0x2d   : > { %4823 = dma.hbm_to_vmem [thread:$0]  (!%p5416_p6), %s6548_s1, 4096, %s5405_s18, [#allocation6], %s5309_s24, %s5309_s24, %s5310_s26  }
  0x2e   : > { %s4964_s12 = scalar_lea.hbm %s6480_s3, 1024 }
  0x2f   : > { %p4965_p4 = scmp.ne.s32.totalorder %s6480_s3, %s4964_s12  ;;  %p4971_p12 = scmp.lt.u32.totalorder %s4964_s12, %s6480_s3 }
  0x31   : > { %p4967_p10 = pnand %p4965_p4, %p5432_p8 }
  0x33   : > { %p4968_p11 = pneg %p4967_p10 }
  0x35   : > { %p4973_p13 = pnand %p4971_p12, %p4968_p11 }
  0x37   : > { %4976 = shalt.err (!%p4973_p13)
}
  0x38   : > { %s4977_s18 = scalar_lea.vmem %s5420_s23, 1024  ;;  %p4985_p7 = scmp.lt.s32.totalorder %s5420_s23, %s5420_s23 }
  0x39   : > { %p4978_p0 = scmp.ne.s32.totalorder %s5420_s23, %s4977_s18  ;;  %p4986_p9 = scmp.lt.s32.totalorder %s4977_s18, %s4977_s18 }
  0x3b   : > { %p4980_p2 = pnand %p4978_p0, %p5432_p8  ;;  %p4987_p4 = por %p4986_p9, %p4985_p7 }
  0x3d   : > { %p4981_p5 = pneg %p4980_p2 }
  0x3f   : > { %p4988_p10 = pnand %p4987_p4, %p4981_p5 }
  0x41   : > { %4991 = shalt.err (!%p4988_p10)
}
  0x42   : > { %s6492_s10 = smov 256   ;;  %s5312_s20 = smov 16  }
  0x43   : > { %4829 = dma.hbm_to_vmem [thread:$0]  (!%p5416_p6), %s6480_s3, 1024, %s5420_s23, [#allocation9], %s6492_s10, %s6492_s10, %s5312_s20  }
  0x44   : > { %s4992_s29 = scalar_lea.hbm %s6482_s5, 128 }
  0x45   : > { %p4993_p11 = scmp.ne.s32.totalorder %s6482_s5, %s4992_s29  ;;  %p4999_p0 = scmp.lt.u32.totalorder %s4992_s29, %s6482_s5 }
  0x47   : > { %p4995_p12 = pnand %p4993_p11, %p5432_p8 }
  0x49   : > { %p4996_p13 = pneg %p4995_p12 }
  0x4b   : > { %p5001_p2 = pnand %p4999_p0, %p4996_p13 }
  0x4d   : > { %5004 = shalt.err (!%p5001_p2)
}
  0x4e   : > { %s5005_s18 = scalar_lea.vmem %s341_s25, 128  ;;  %p5013_p4 = scmp.lt.s32.totalorder %s341_s25, %s341_s25 }
  0x4f   : > { %p5006_p5 = scmp.ne.s32.totalorder %s341_s25, %s5005_s18  ;;  %p5014_p10 = scmp.lt.s32.totalorder %s5005_s18, %s5005_s18 }
  0x51   : > { %p5008_p7 = pnand %p5006_p5, %p5432_p8  ;;  %p5015_p1 = por %p5014_p10, %p5013_p4 }
  0x53   : > { %p5009_p9 = pneg %p5008_p7 }
  0x55   : > { %p5016_p3 = pnand %p5015_p1, %p5009_p9 }
  0x57   : > { %5019 = shalt.err (!%p5016_p3)
}
  0x58   : > { %4835 = dma.hbm_to_vmem [thread:$0]  (!%p5416_p6), %s6482_s5, 128, %s341_s25, [#allocation12]  }
  0x59   : > { %s5313_s26 = smov [#allocation14]   ;;  %s5314_s28 = smov [#allocation7]  }
  0x5a   : > { %s362_s27 = sshll.u32 %s5313_s26, 4  ;;  %s302_s29 = sshll.u32 %s5314_s28, 4  ;;  %s363_s27 = int_to_ptr.vmem [resolvable:$true] %s362_s27  ;;  %s303_s29 = int_to_ptr.vmem [resolvable:$true] %s302_s29 }
  0x5b   : > { %s5020_s17 = scalar_lea.hbm %s6484_s7, 64 }
  0x5c   : > { %p5021_p1 = scmp.ne.s32.totalorder %s6484_s7, %s5020_s17  ;;  %p5027_p12 = scmp.lt.u32.totalorder %s5020_s17, %s6484_s7 }
  0x5e   : > { %p5023_p3 = pnand %p5021_p1, %p5432_p8 }
  0x60   : > { %p5024_p11 = pneg %p5023_p3 }
  0x62   : > { %p5029_p13 = pnand %p5027_p12, %p5024_p11 }
  0x64   : > { %5032 = shalt.err (!%p5029_p13)
}
  0x65   : > { %s5033_s25 = scalar_lea.vmem %s363_s27, 64  ;;  %p5041_p7 = scmp.lt.s32.totalorder %s363_s27, %s363_s27 }
  0x66   : > { %p5034_p0 = scmp.ne.s32.totalorder %s363_s27, %s5033_s25  ;;  %p5042_p9 = scmp.lt.s32.totalorder %s5033_s25, %s5033_s25 }
  0x68   : > { %p5036_p2 = pnand %p5034_p0, %p5432_p8  ;;  %p5043_p4 = por %p5042_p9, %p5041_p7 }
  0x6a   : > { %p5037_p5 = pneg %p5036_p2 }
  0x6c   : > { %p5044_p10 = pnand %p5043_p4, %p5037_p5 }
  0x6e   : > { %5047 = shalt.err (!%p5044_p10)
}
  0x6f   : > { %4841 = dma.hbm_to_vmem [thread:$0]  (!%p5416_p6), %s6484_s7, 64, %s363_s27, [#allocation15]  }
  0x70   : > { %s5048_s30 = scalar_lea.hbm %s6479_s2, 1024 }
  0x71   : > { %p5049_p1 = scmp.ne.s32.totalorder %s6479_s2, %s5048_s30  ;;  %p5055_p12 = scmp.lt.u32.totalorder %s5048_s30, %s6479_s2 }
  0x73   : > { %p5051_p3 = pnand %p5049_p1, %p5432_p8 }
  0x75   : > { %p5052_p11 = pneg %p5051_p3 }
  0x77   : > { %p5057_p13 = pnand %p5055_p12, %p5052_p11 }
  0x79   : > { %5060 = shalt.err (!%p5057_p13)
}
  0x7a   : > { %s5061_s23 = scalar_lea.vmem %s303_s29, 1024  ;;  %p5069_p7 = scmp.lt.s32.totalorder %s303_s29, %s303_s29 }
  0x7b   : > { %p5062_p0 = scmp.ne.s32.totalorder %s303_s29, %s5061_s23  ;;  %p5070_p9 = scmp.lt.s32.totalorder %s5061_s23, %s5061_s23 }
  0x7d   : > { %p5064_p2 = pnand %p5062_p0, %p5432_p8  ;;  %p5071_p4 = por %p5070_p9, %p5069_p7 }
  0x7f   : > { %p5065_p5 = pneg %p5064_p2 }
  0x81   : > { %p5072_p10 = pnand %p5071_p4, %p5065_p5 }
  0x83   : > { %5075 = shalt.err (!%p5072_p10)
}
  0x84   : > { %s6550_s27 = smov 256   ;;  %s5315_s26 = smov [#allocation10]  }
  0x85   : > { %4826 = dma.hbm_to_vmem [thread:$0]  (!%p5416_p6), %s6479_s2, 1024, %s303_s29, [#allocation6], %s6550_s27, %s6550_s27, %s5312_s20  }
  0x86   : > { %s329_s10 = sshll.u32 %s5315_s26, 4  ;;  %s5316_s28 = smov [#allocation13]   ;;  %s330_s10 = int_to_ptr.vmem [resolvable:$true] %s329_s10 }
  0x87   : > { %s351_s30 = sshll.u32 %s5316_s28, 4  ;;  %s5076_s22 = scalar_lea.hbm %s6481_s4, 128  ;;  %s352_s30 = int_to_ptr.vmem [resolvable:$true] %s351_s30 }
  0x88   : > { %p5077_p1 = scmp.ne.s32.totalorder %s6481_s4, %s5076_s22  ;;  %p5083_p12 = scmp.lt.u32.totalorder %s5076_s22, %s6481_s4 }
  0x8a   : > { %p5079_p3 = pnand %p5077_p1, %p5432_p8 }
  0x8c   : > { %p5080_p11 = pneg %p5079_p3 }
  0x8e   : > { %p5085_p13 = pnand %p5083_p12, %p5080_p11 }
  0x90   : > { %5088 = shalt.err (!%p5085_p13)
}
  0x91   : > { %s5089_s20 = scalar_lea.vmem %s330_s10, 128  ;;  %p5097_p7 = scmp.lt.s32.totalorder %s330_s10, %s330_s10 }
  0x92   : > { %p5090_p0 = scmp.ne.s32.totalorder %s330_s10, %s5089_s20  ;;  %p5098_p9 = scmp.lt.s32.totalorder %s5089_s20, %s5089_s20 }
  0x94   : > { %p5092_p2 = pnand %p5090_p0, %p5432_p8  ;;  %p5099_p4 = por %p5098_p9, %p5097_p7 }
  0x96   : > { %p5093_p5 = pneg %p5092_p2 }
  0x98   : > { %p5100_p10 = pnand %p5099_p4, %p5093_p5 }
  0x9a   : > { %5103 = shalt.err (!%p5100_p10)
}
  0x9b   : > { %4832 = dma.hbm_to_vmem [thread:$0]  (!%p5416_p6), %s6481_s4, 128, %s330_s10, [#allocation9]  }
  0x9c   : > { %s5104_s26 = scalar_lea.hbm %s6483_s6, 64 }
  0x9d   : > { %p5105_p1 = scmp.ne.s32.totalorder %s6483_s6, %s5104_s26  ;;  %p5111_p12 = scmp.lt.u32.totalorder %s5104_s26, %s6483_s6 }
  0x9f   : > { %p5107_p3 = pnand %p5105_p1, %p5432_p8 }
  0xa1   : > { %p5108_p11 = pneg %p5107_p3 }
  0xa3   : > { %p5113_p13 = pnand %p5111_p12, %p5108_p11 }
  0xa5   : > { %5116 = shalt.err (!%p5113_p13)
}
  0xa6   : > { %s5117_s18 = scalar_lea.vmem %s352_s30, 64  ;;  %p5125_p7 = scmp.lt.s32.totalorder %s352_s30, %s352_s30 }
  0xa7   : > { %p5118_p0 = scmp.ne.s32.totalorder %s352_s30, %s5117_s18  ;;  %p5126_p9 = scmp.lt.s32.totalorder %s5117_s18, %s5117_s18 }
  0xa9   : > { %p5120_p2 = pnand %p5118_p0, %p5432_p8  ;;  %p5127_p4 = por %p5126_p9, %p5125_p7 }
  0xab   : > { %p5121_p5 = pneg %p5120_p2 }
  0xad   : > { %p5128_p10 = pnand %p5127_p4, %p5121_p5 }
  0xaf   : > { %5131 = shalt.err (!%p5128_p10)
}
  0xb0   : > { %4838 = dma.hbm_to_vmem [thread:$0]  (!%p5416_p6), %s6483_s6, 64, %s352_s30, [#allocation12]  }
  0xb1   : > { %s5317_s25 = smov [#allocation16]   ;;  %s5318_s29 = smov [#allocation17]  }
  0xb2   : > { %s373_s20 = sshll.u32 %s5317_s25, 4  ;;  %s384_s27 = sshll.u32 %s5318_s29, 4  ;;  %s374_s20 = int_to_ptr.vmem [resolvable:$true] %s373_s20  ;;  %s385_s27 = int_to_ptr.vmem [resolvable:$true] %s384_s27 }
  0xb3   : > { %s5132_s26 = scalar_lea.hbm %s6485_s8, 64 }
  0xb4   : > { %p5133_p1 = scmp.ne.s32.totalorder %s6485_s8, %s5132_s26  ;;  %p5139_p12 = scmp.lt.u32.totalorder %s5132_s26, %s6485_s8 }
  0xb6   : > { %p5135_p3 = pnand %p5133_p1, %p5432_p8 }
  0xb8   : > { %p5136_p11 = pneg %p5135_p3 }
  0xba   : > { %p5141_p13 = pnand %p5139_p12, %p5136_p11 }
  0xbc   : > { %5144 = shalt.err (!%p5141_p13)
}
  0xbd   : > { %s5145_s30 = scalar_lea.vmem %s374_s20, 64  ;;  %p5153_p7 = scmp.lt.s32.totalorder %s374_s20, %s374_s20 }
  0xbe   : > { %p5146_p0 = scmp.ne.s32.totalorder %s374_s20, %s5145_s30  ;;  %p5154_p9 = scmp.lt.s32.totalorder %s5145_s30, %s5145_s30 }
  0xc0   : > { %p5148_p2 = pnand %p5146_p0, %p5432_p8  ;;  %p5155_p4 = por %p5154_p9, %p5153_p7 }
  0xc2   : > { %p5149_p5 = pneg %p5148_p2 }
  0xc4   : > { %p5156_p10 = pnand %p5155_p4, %p5149_p5 }
  0xc6   : > { %5159 = shalt.err (!%p5156_p10)
}
  0xc7   : > { %4844 = dma.hbm_to_vmem [thread:$0]  (!%p5416_p6), %s6485_s8, 64, %s374_s20, [#allocation15]  }
  0xc8   : > { %s5160_s29 = scalar_lea.hbm %s6486_s9, 64 }
  0xc9   : > { %p5161_p1 = scmp.ne.s32.totalorder %s6486_s9, %s5160_s29  ;;  %p5167_p12 = scmp.lt.u32.totalorder %s5160_s29, %s6486_s9 }
  0xcb   : > { %p5163_p3 = pnand %p5161_p1, %p5432_p8 }
  0xcd   : > { %p5164_p11 = pneg %p5163_p3 }
  0xcf   : > { %p5169_p13 = pnand %p5167_p12, %p5164_p11 }
  0xd1   : > { %5172 = shalt.err (!%p5169_p13)
}
  0xd2   : > { %s5173_s12 = scalar_lea.vmem %s385_s27, 64  ;;  %p5181_p7 = scmp.lt.s32.totalorder %s385_s27, %s385_s27 }
  0xd3   : > { %p5174_p0 = scmp.ne.s32.totalorder %s385_s27, %s5173_s12  ;;  %p5182_p9 = scmp.lt.s32.totalorder %s5173_s12, %s5173_s12 }
  0xd5   : > { %p5176_p2 = pnand %p5174_p0, %p5432_p8  ;;  %p5183_p4 = por %p5182_p9, %p5181_p7 }
  0xd7   : > { %p5177_p5 = pneg %p5176_p2 }
  0xd9   : > { %p5184_p10 = pnand %p5183_p4, %p5177_p5 }
  0xdb   : > { %5187 = shalt.err (!%p5184_p10)
}
  0xdc   : > { %4847 = dma.hbm_to_vmem [thread:$0]  (!%p5416_p6), %s6486_s9, 64, %s385_s27, [#allocation18]  }
  0xdd   : > { %s4068_s11 = sadd.s32 4294967294, %s5304_s16   ;;  %s5611_s21 = sadd.s32 1, %s5304_s16  }
  0xde   : > { %s38_s22 = sadd.s32 1, %s5300_s15  ;;  %s35_s30 = ssub.s32 %s5304_s16, %s5611_s21 }
  0xdf   : > { %p45_p8 = scmp.ne.s32.totalorder %s5300_s15, %s5296_s14  ;;  %p36_p1 = scmp.eq.s32.totalorder %s35_s30, 0 }
  0xe0   : > { %p46_p3 = scmp.eq.s32.totalorder %s5304_s16, 0  ;;  %p51_p11 = scmp.ne.s32.totalorder %s5296_s14, %s5292_s13 }
  0xe1   : > { %p264_p12 = scmp.eq.s32.totalorder %s5400_s19, 1  ;;  %p6551_p0 = scmp.eq.s32.totalorder %s5400_s19, 0 }
  0xe2   : > { %s5623_s18 = scalar_select %p36_p1, %s5300_s15, %s38_s22  }
  0xe3   : > { %p47_p13 = por %p46_p3, %p45_p8  ;;  %p5627_p2 = por %p6551_p0, %p51_p11 }
  0xe4   : > { %p5631_p6 = por %p264_p12, %p45_p8  ;;  %p270_p5 = scmp.eq.s32.totalorder %s4068_s11, 1 }
  0xe5   : > { %p4865_p7 = scmp.lt.s32.totalorder %s5304_s16, 2  ;;  %s395_s23 = sand.u32 1, %s5300_s15  }
  0xe6   : > { %s6553_s27 = scalar_select %p5631_p6, 1, 0 }
  0xe7   : > { %p5637_p9 = por %p270_p5, %p51_p11  ;;  %s4080_s29 = sshll.u32 %s395_s23, 3 }
  0xe8   : > { %s4102_s1 = sshll.u32 %s5304_s16, 7  ;;  %s399_s12 = scalar_lea.vmem [#allocation2], %s4080_s29 }
  0xe9   : > { %s6554_s25 = scalar_select %p5637_p9, 1, 0 }
  0xea   : > { %s5645_s28 = scalar_lea.hbm %s6477_s0, %s4102_s1  ;;  %s407_s20 = sshll.u32 %s399_s12, 4  ;;  %s5651_s20 = int_to_ptr.vmem [resolvable:$true] %s407_s20 }
  0xeb   : > { %p5647_p4 = pnand %p4865_p7, %p47_p13  ;;  %s396_s11 = scalar_lea.sflag [#allocation3], %s395_s23 }
  0xec   : > { %s5188_s22 = scalar_lea.hbm %s5645_s28, 128  ;;  %s5193_s1 = scalar_lea.hbm %s6477_s0, 256 }
  0xed   : > { %p5189_p10 = scmp.ne.s32.totalorder %s5645_s28, %s5188_s22  ;;  %p5190_p8 = pneg %p5647_p4 }
  0xee   : > { %p5194_p11 = scmp.lt.u32.totalorder %s5645_s28, %s6477_s0  ;;  %p5195_p12 = scmp.lt.u32.totalorder %s5193_s1, %s5188_s22 }
  0xef   : > { %p5191_p1 = pnand %p5190_p8, %p5189_p10  ;;  %p5197_p0 = scmp.lt.u32.totalorder %s5188_s22, %s5645_s28 }
  0xf0   : > { %p5196_p13 = por %p5195_p12, %p5194_p11 }
  0xf1   : > { %p5192_p3 = pneg %p5191_p1 }
  0xf2   : > { %p5198_p5 = por %p5197_p0, %p5196_p13 }
  0xf4   : > { %p5199_p7 = pnand %p5198_p5, %p5192_p3 }
  0xf6   : > { %5202 = shalt.err (!%p5199_p7)
}
  0xf7   : > { %s5203_s23 = scalar_lea.vmem %s5651_s20, 128  ;;  %s5319_s12 = smov [#allocation2]  }
  0xf8   : > { %p5204_p10 = scmp.ne.s32.totalorder %s5651_s20, %s5203_s23  ;;  %s5208_s30 = sshll.u32 %s5319_s12, 4  ;;  %s5209_s30 = int_to_ptr.vmem [resolvable:$false] %s5208_s30 }
  0xf9   : > { %s5210_s29 = scalar_lea.vmem %s5209_s30, 256  ;;  %p5211_p6 = scmp.lt.s32.totalorder %s5651_s20, %s5209_s30 }
  0xfa   : > { %p5206_p1 = pnand %p5204_p10, %p5190_p8  ;;  %p5212_p11 = scmp.lt.s32.totalorder %s5210_s29, %s5203_s23 }
  0xfc   : > { %p5207_p9 = pneg %p5206_p1  ;;  %p5213_p12 = por %p5212_p11, %p5211_p6 }
  0xfe   : > { %p5214_p13 = pnand %p5213_p12, %p5207_p9 }
 0x100   : > { %5217 = shalt.err (!%p5214_p13)
}
 0x101   : > { %4851 = dma.hbm_to_vmem [thread:$0]  (!%p5647_p4), %s5645_s28, 128, %s5651_s20, %s396_s11  }
 0x102   : > { %s6556_s22 = sld [smem:[#allocation27_spill]] }
 0x108   : > { %p6557_p3 = scmp.ne.s32.totalorder %s6556_s22, 0 }
 0x10a   : > { %416 = sbr.rel (%p6557_p3) target bundleno = 1471 (0x5bf), region = 60 }
 0x111   : > { %s5681_s1 = sand.u32 1, %s5296_s14  }
 0x112   : > { %s4084_s24 = sshll.u32 %s5681_s1, 3  ;;  %s419_s26 = scalar_lea.sflag [#allocation3], %s5681_s1 }
 0x113   : > { %s5687_s23 = scalar_lea.vmem [#allocation2], %s4084_s24 }
 0x114   : > { %5263 = dma.done.wait (%p5627_p2), %s419_s26, 128  }
 0x115   : > { %5265 = vsyncadd (%p5627_p2), %s419_s26, 4294967168  ;;  %p6558_p6 = scmp.eq.s32.totalorder %s5400_s19, 0 }
 0x117   : > { %5267 = dma.done.wait (%p6558_p6), [#allocation6], 5120   ;;  %p6559_p9 = pmov %p6558_p6 }
 0x118   : > { %p6560_p4 = pmov %p6558_p6 }
 0x119   : > { %5269 = vsyncadd (%p6559_p9), [#allocation6], 4294962176 }
 0x11a   : > { %5271 = dma.done.wait (%p6560_p4), [#allocation9], 1152   ;;  %p6561_p8 = pmov %p6560_p4 }
 0x11b   : > { %p6562_p0 = pmov %p6560_p4 }
 0x11c   : > { %5273 = vsyncadd (%p6561_p8), [#allocation9], 4294966144 }
 0x11d   : > { %5275 = dma.done.wait (%p6562_p0), [#allocation12], 192   ;;  %p6563_p5 = pmov %p6562_p0 }
 0x11e   : > { %p6564_p2 = pmov %p6562_p0 }
 0x11f   : > { %5277 = vsyncadd (%p6563_p5), [#allocation12], 4294967104 }
 0x120   : > { %5279 = dma.done.wait (%p6564_p2), [#allocation15], 128   ;;  %p6565_p7 = pmov %p6562_p0 }
 0x121   : > { %p6566_p10 = pmov %p6562_p0 }
 0x122   : > { %5281 = vsyncadd (%p6565_p7), [#allocation15], 4294967168 }
 0x123   : > { %5283 = dma.done.wait (%p6566_p10), [#allocation18], 64   ;;  %p6567_p1 = pmov %p6562_p0 }
 0x124   : > { %v512_v0 = vld [vmem:[#allocation5 + $0x80] sm:$0xff]  ;;  %v513_v1 = vld [vmem:[#allocation5 + $0x88] sm:$0xff]  ;;  %v514_v7 = vld [vmem:[#allocation5 + $0x90] sm:$0xff]  ;;  %vm5321_vm0 = vmmov 0   ;;  %vm1400_vm1 = vcmask 31744   ;;  %vm1404_vm2 = vcmask 1043456  }
 0x125   : > { %5285 = vsyncadd (%p6567_p1), [#allocation18], 4294967232  ;;  %v496_v2 = vld [vmem:[#allocation5] sm:$0xff]  ;;  %v580_v3 = vand.u32 4294901760, %v512_v0  ;;  %v583_v4 = vand.u32 4294901760, %v513_v1  ;;  %v497_v5 = vld [vmem:[#allocation5 + $0x8] sm:$0xff] }
 0x126   : > { %v532_v6 = vand.u32 4294901760, %v496_v2  ;;  %v515_v8 = vld [vmem:[#allocation5 + $0x98] sm:$0xff]  ;;  %v535_v9 = vand.u32 4294901760, %v497_v5  ;;  %v586_v10 = vand.u32 4294901760, %v514_v7  ;;  %v498_v12 = vld [vmem:[#allocation5 + $0x10] sm:$0xff]  ;;  %v516_v18 = vld [vmem:[#allocation5 + $0xa0] sm:$0xff] }
 0x127   : > { %v589_v11 = vand.u32 4294901760, %v515_v8  ;;  %v499_v13 = vld [vmem:[#allocation5 + $0x18] sm:$0xff]  ;;  %v5713_v14 = vpack.c.bf16 %v583_v4, %v580_v3  ;;  %v538_v16 = vand.u32 4294901760, %v498_v12  ;;  %v517_v19 = vld [vmem:[#allocation5 + $0xa8] sm:$0xff]  ;;  %v500_v23 = vld [vmem:[#allocation5 + $0x20] sm:$0xff]  ;;  %v592_v29 = vand.u32 4294901760, %v516_v18 }
 0x128   : > { %v5715_v15 = vsub.f32 %v496_v2, %v532_v6  ;;  %v541_v17 = vand.u32 4294901760, %v499_v13  ;;  %v5717_v20 = vpack.c.bf16 %v535_v9, %v532_v6  ;;  %v5719_v21 = vsub.f32 %v497_v5, %v535_v9  ;;  %v501_v24 = vld [vmem:[#allocation5 + $0x28] sm:$0xff]  ;;  %v518_v37 = vld [vmem:[#allocation5 + $0xb0] sm:$0xff]  ;;  %v519_v42 = vld [vmem:[#allocation5 + $0xb8] sm:$0xff]  ;;  %s4103_s10 = sshll.u32 %s5400_s19, 7  ;;  %s494_s28 = scalar_lea.vmem [#allocation19], %s4084_s24 }
 0x129   : > { %v5721_v22 = vpack.c.bf16 %v589_v11, %v586_v10  ;;  %4441 = vmatprep.subr.bf16.mxu0 %v5713_v14  ;;  %v5724_v25 = vsub.f32 %v514_v7, %v586_v10  ;;  %v5726_v26 = vsub.f32 %v515_v8, %v589_v11  ;;  %v5730_v28 = vsub.f32 %v498_v12, %v538_v16  ;;  %v502_v55 = vld [vmem:[#allocation5 + $0x30] sm:$0xff]  ;;  %v503_v56 = vld [vmem:[#allocation5 + $0x38] sm:$0xff]  ;;  %v520_v5 = vld [vmem:[#allocation5 + $0xc0] sm:$0xff]  ;;  %s3912_s20 = sshll.u32 %s494_s28, 4  ;;  %s6619_s12 = sld [smem:[#allocation35_spill]]  ;;  %s6435_s20 = int_to_ptr.vmem [resolvable:$true] %s3912_s20 }
 0x12a   : > { %v5728_v27 = vpack.c.bf16 %v541_v17, %v538_v16  ;;  %4443 = vmatpush3.bf16.msra.mxu0 %v5717_v20  ;;  %v595_v30 = vand.u32 4294901760, %v517_v19  ;;  %v5733_v31 = vsub.f32 %v512_v0, %v580_v3  ;;  %v5735_v32 = vsub.f32 %v513_v1, %v583_v4  ;;  %v521_v6 = vld [vmem:[#allocation5 + $0xc8] sm:$0xff]  ;;  %v504_v11 = vld [vmem:[#allocation5 + $0x40] sm:$0xff]  ;;  %s3898_s29 = scalar_lea.sflag [#allocation4], %s5681_s1  ;;  %s5218_s22 = scalar_lea.vmem %s6435_s20, 128 }
 0x12b   : > { %4445 = vmatprep.subr.bf16.mxu0 %v5721_v22  ;;  %v544_v33 = vand.u32 4294901760, %v500_v23  ;;  %v547_v34 = vand.u32 4294901760, %v501_v24  ;;  %v6510_v35 = vand.u32 4294901760, %v5715_v15  ;;  %v6508_v36 = vand.u32 4294901760, %v5719_v21  ;;  %p5219_p11 = scmp.ne.s32.totalorder %s6435_s20, %s5218_s22  ;;  %p6620_p12 = scmp.ne.s32.totalorder %s6553_s27, 0 }
 0x12c   : > { %v5740_v38 = vsub.f32 %v499_v13, %v541_v17  ;;  %v5742_v39 = vpack.c.bf16 %v595_v30, %v592_v29  ;;  %v5744_v40 = vsub.f32 %v516_v18, %v592_v29  ;;  %v6513_v41 = vand.u32 4294901760, %v5733_v31  ;;  %v505_v29 = vld [vmem:[#allocation5 + $0x48] sm:$0xff]  ;;  %s5323_s19 = smov [#allocation19]  }
 0x12d   : > { %v5747_v43 = vsub.f32 %v517_v19, %v595_v30  ;;  %v6512_v44 = vand.u32 4294901760, %v5735_v32  ;;  %v5750_v45 = vpack.c.bf16 %v547_v34, %v544_v33  ;;  %v5752_v46 = vsub.f32 %v500_v23, %v544_v33  ;;  %p5220_p13 = pnand %p5219_p11, %p6620_p12  ;;  %s5222_s24 = sshll.u32 %s5323_s19, 4  ;;  %s5223_s24 = int_to_ptr.vmem [resolvable:$false] %s5222_s24 }
 0x12e   : > { %4447 = vmatpush3.bf16.msra.mxu0 %v5728_v27  ;;  %v759_v47 = vsub.f32 %v5733_v31, %v6513_v41  ;;  %v647_v48 = vsub.f32 %v5715_v15, %v6510_v35  ;;  %v654_v49 = vsub.f32 %v5719_v21, %v6508_v36  ;;  %v598_v50 = vand.u32 4294901760, %v518_v37  ;;  %v495_v41 = vld [vmem:[%s5687_s23] sm:$0xff]  ;;  %s5224_s26 = scalar_lea.vmem %s5223_s24, 256  ;;  %p5225_p6 = scmp.lt.s32.totalorder %s6435_s20, %s5223_s24 }
 0x12f   : > { %4449 = vmatprep.subr.bf16.mxu0 %v5742_v39  ;;  %v766_v51 = vsub.f32 %v5735_v32, %v6512_v44  ;;  %v601_v52 = vand.u32 4294901760, %v519_v42  ;;  %v6506_v53 = vand.u32 4294901760, %v5724_v25  ;;  %v6504_v54 = vand.u32 4294901760, %v5726_v26  ;;  %s6433_s30 = scalar_lea.hbm %s6619_s12, %s4103_s10  ;;  %p5221_p3 = pneg %p5220_p13 }
 0x130   : > { %v760_v57 = vand.u32 4294901760, %v759_v47  ;;  %v5770_v58 = vsub.f32 %v501_v24, %v547_v34  ;;  %v648_v59 = vand.u32 4294901760, %v647_v48  ;;  %v655_v60 = vand.u32 4294901760, %v654_v49  ;;  %p5226_p9 = scmp.lt.s32.totalorder %s5224_s26, %s5218_s22 }
 0x131   : > { %v767_v61 = vand.u32 4294901760, %v766_v51  ;;  %v5772_v62 = vpack.c.bf16 %v601_v52, %v598_v50  ;;  %v5774_v63 = vsub.f32 %v518_v37, %v598_v50  ;;  %v773_v0 = vsub.f32 %v5724_v25, %v6506_v53 }
 0x132   : > { %4451 = vmatpush3.bf16.msra.mxu0 %v5750_v45  ;;  %v4474_v1 = vpack.c.bf16 %v655_v60, %v648_v59  ;;  %v780_v2 = vsub.f32 %v5726_v26, %v6504_v54  ;;  %v550_v3 = vand.u32 4294901760, %v502_v55  ;;  %v553_v4 = vand.u32 4294901760, %v503_v56  ;;  %v523_v59 = vld [vmem:[#allocation5 + $0xd8] sm:$0xff]  ;;  %p5227_p4 = por %p5226_p9, %p5225_p6 }
 0x133   : > { %v4472_v7 = vpack.c.bf16 %v767_v61, %v760_v57  ;;  %4453 = vmatprep.subr.bf16.mxu0 %v5772_v62  ;;  %v774_v8 = vand.u32 4294901760, %v773_v0  ;;  %v6503_v9 = vand.u32 4294901760, %v5730_v28  ;;  %v6501_v10 = vand.u32 4294901760, %v5740_v38  ;;  %v522_v57 = vld [vmem:[#allocation5 + $0xd0] sm:$0xff]  ;;  %v527_v54 = vld [vmem:[#allocation5 + $0xf8] sm:$0xff] }
 0x134   : > { %v5786_v12 = vsub.f32 %v519_v42, %v601_v52  ;;  %v781_v13 = vand.u32 4294901760, %v780_v2  ;;  %v5788_v16 = vpack.c.bf16 %v553_v4, %v550_v3  ;;  %v5790_v17 = vsub.f32 %v502_v55, %v550_v3  ;;  %p5228_p8 = pnand %p5227_p4, %p5221_p3 }
 0x135   : > { %4473 = vmatprep.subr.bf16.mxu1 %v4472_v7  ;;  %v661_v18 = vsub.f32 %v5730_v28, %v6503_v9  ;;  %v668_v19 = vsub.f32 %v5740_v38, %v6501_v10  ;;  %v604_v23 = vand.u32 4294901760, %v520_v5  ;;  %v607_v24 = vand.u32 4294901760, %v521_v6  ;;  %v526_v9 = vld [vmem:[#allocation5 + $0xf0] sm:$0xff] }
 0x136   : > { %4475 = vmatpush3.bf16.msra.mxu1 %v4474_v1  ;;  %v4476_v30 = vpack.c.bf16 %v781_v13, %v774_v8  ;;  %4455 = vmatpush3.bf16.msra.mxu0 %v5788_v16  ;;  %v6499_v33 = vand.u32 4294901760, %v5744_v40  ;;  %v6498_v34 = vand.u32 4294901760, %v5747_v43  ;;  %v556_v37 = vand.u32 4294901760, %v504_v11  ;;  %v506_v1 = vld [vmem:[#allocation5 + $0x50] sm:$0xff] }
 0x137   : > { %v5801_v42 = vsub.f32 %v503_v56, %v553_v4  ;;  %v662_v47 = vand.u32 4294901760, %v661_v18  ;;  %v669_v48 = vand.u32 4294901760, %v668_v19  ;;  %v5803_v49 = vpack.c.bf16 %v607_v24, %v604_v23  ;;  %v507_v18 = vld [vmem:[#allocation5 + $0x58] sm:$0xff] }
 0x138   : > { %4477 = vmatprep.subr.bf16.mxu1 %v4476_v30  ;;  %v5805_v50 = vsub.f32 %v520_v5, %v604_v23  ;;  %v787_v51 = vsub.f32 %v5744_v40, %v6499_v33  ;;  %v794_v52 = vsub.f32 %v5747_v43, %v6498_v34  ;;  %v559_v55 = vand.u32 4294901760, %v505_v29 }
 0x139   : > { %v4478_v56 = vpack.c.bf16 %v669_v48, %v662_v47  ;;  %4457 = vmatprep.subr.bf16.mxu0 %v5803_v49  ;;  %v5814_v60 = vsub.f32 %v521_v6, %v607_v24  ;;  %v6496_v61 = vand.u32 4294901760, %v5752_v46  ;;  %v6494_v0 = vand.u32 4294901760, %v5770_v58 }
 0x13a   : > { %v788_v2 = vand.u32 4294901760, %v787_v51  ;;  %v795_v3 = vand.u32 4294901760, %v794_v52  ;;  %v5818_v4 = vpack.c.bf16 %v559_v55, %v556_v37  ;;  %v5820_v5 = vsub.f32 %v504_v11, %v556_v37 }
 0x13b   : > { %4479 = vmatpush3.bf16.msra.mxu1 %v4478_v56  ;;  %v675_v7 = vsub.f32 %v5752_v46, %v6496_v61  ;;  %v682_v6 = vsub.f32 %v5770_v58, %v6494_v0  ;;  %v610_v8 = vand.u32 4294901760, %v522_v57  ;;  %v613_v13 = vand.u32 4294901760, %v523_v59  ;;  %v525_v0 = vld [vmem:[#allocation5 + $0xe8] sm:$0xff] }
 0x13c   : > { %v4480_v19 = vpack.c.bf16 %v795_v3, %v788_v2  ;;  %4459 = vmatpush3.bf16.msra.mxu0 %v5818_v4  ;;  %v6495_v23 = vand.u32 4294901760, %v5774_v63  ;;  %v6497_v11 = vand.u32 4294901760, %v5786_v12  ;;  %v562_v24 = vand.u32 4294901760, %v506_v1  ;;  %v524_v3 = vld [vmem:[#allocation5 + $0xe0] sm:$0xff] }
 0x13d   : > { %v5831_v30 = vsub.f32 %v505_v29, %v559_v55  ;;  %v676_v37 = vand.u32 4294901760, %v675_v7  ;;  %v683_v47 = vand.u32 4294901760, %v682_v6  ;;  %v5833_v48 = vpack.c.bf16 %v613_v13, %v610_v8  ;;  %v508_v6 = vld [vmem:[#allocation5 + $0x60] sm:$0xff] }
 0x13e   : > { %4481 = vmatprep.subr.bf16.mxu1 %v4480_v19  ;;  %v5835_v51 = vsub.f32 %v522_v57, %v610_v8  ;;  %v801_v52 = vsub.f32 %v5774_v63, %v6495_v23  ;;  %v808_v56 = vsub.f32 %v5786_v12, %v6497_v11  ;;  %v565_v2 = vand.u32 4294901760, %v507_v18  ;;  %v509_v11 = vld [vmem:[#allocation5 + $0x68] sm:$0xff] }
 0x13f   : > { %v4482_v29 = vpack.c.bf16 %v683_v47, %v676_v37  ;;  %4461 = vmatprep.subr.bf16.mxu0 %v5833_v48  ;;  %v5844_v55 = vsub.f32 %v523_v59, %v613_v13  ;;  %v6500_v7 = vand.u32 4294901760, %v5790_v17  ;;  %v6502_v57 = vand.u32 4294901760, %v5801_v42 }
 0x140   : > { %v802_v8 = vand.u32 4294901760, %v801_v52  ;;  %v809_v19 = vand.u32 4294901760, %v808_v56  ;;  %v5848_v23 = vpack.c.bf16 %v565_v2, %v562_v24  ;;  %v5850_v61 = vsub.f32 %v506_v1, %v562_v24 }
 0x141   : > { %4483 = vmatpush3.bf16.msra.mxu1 %v4482_v29  ;;  %v689_v37 = vsub.f32 %v5790_v17, %v6500_v7  ;;  %v696_v59 = vsub.f32 %v5801_v42, %v6502_v57  ;;  %v616_v13 = vand.u32 4294901760, %v524_v3  ;;  %v619_v47 = vand.u32 4294901760, %v525_v0 }
 0x142   : > { %v4484_v34 = vpack.c.bf16 %v809_v19, %v802_v8  ;;  %4463 = vmatpush3.bf16.msra.mxu0 %v5848_v23  ;;  %v6505_v52 = vand.u32 4294901760, %v5805_v50  ;;  %v6507_v1 = vand.u32 4294901760, %v5814_v60  ;;  %v568_v24 = vand.u32 4294901760, %v508_v6 }
 0x143   : > { %v5861_v56 = vsub.f32 %v507_v18, %v565_v2  ;;  %v690_v29 = vand.u32 4294901760, %v689_v37  ;;  %v697_v33 = vand.u32 4294901760, %v696_v59  ;;  %v5863_v7 = vpack.c.bf16 %v619_v47, %v616_v13  ;;  %v510_v37 = vld [vmem:[#allocation5 + $0x70] sm:$0xff] }
 0x144   : > { %4485 = vmatprep.subr.bf16.mxu1 %v4484_v34  ;;  %v5865_v10 = vsub.f32 %v524_v3, %v616_v13  ;;  %v815_v8 = vsub.f32 %v5805_v50, %v6505_v52  ;;  %v822_v19 = vsub.f32 %v5814_v60, %v6507_v1  ;;  %v571_v57 = vand.u32 4294901760, %v509_v11  ;;  %v511_v1 = vld [vmem:[#allocation5 + $0x78] sm:$0xff] }
 0x145   : > { %6568 = vst [vmem:[#allocation28_spill] sm:$0xff] %v5863_v7  ;;  %v4486_v18 = vpack.c.bf16 %v697_v33, %v690_v29  ;;  %4465 = vmatprep.subr.bf16.mxu0 %v5863_v7  ;;  %v5874_v2 = vsub.f32 %v525_v0, %v619_v47  ;;  %v6509_v34 = vand.u32 4294901760, %v5820_v5  ;;  %v6511_v3 = vand.u32 4294901760, %v5831_v30 }
 0x146   : > { %v816_v59 = vand.u32 4294901760, %v815_v8  ;;  %v823_v13 = vand.u32 4294901760, %v822_v19  ;;  %v5878_v52 = vpack.c.bf16 %v571_v57, %v568_v24  ;;  %v5880_v53 = vsub.f32 %v508_v6, %v568_v24 }
 0x147   : > { %4487 = vmatpush3.bf16.msra.mxu1 %v4486_v18  ;;  %v703_v33 = vsub.f32 %v5820_v5, %v6509_v34  ;;  %v710_v0 = vsub.f32 %v5831_v30, %v6511_v3  ;;  %v622_v47 = vand.u32 4294901760, %v526_v9  ;;  %v625_v29 = vand.u32 4294901760, %v527_v54 }
 0x148   : > { %6569 = vst [vmem:[#allocation29_spill] sm:$0xff] %v5878_v52  ;;  %v4488_v36 = vpack.c.bf16 %v823_v13, %v816_v59  ;;  %4467 = vmatpush3.bf16.msra.mxu0 %v5878_v52  ;;  %v6518_v8 = vand.u32 4294901760, %v5835_v51  ;;  %v6516_v6 = vand.u32 4294901760, %v5844_v55  ;;  %v574_v24 = vand.u32 4294901760, %v510_v37 }
 0x149   : > { %v5891_v19 = vsub.f32 %v509_v11, %v571_v57  ;;  %v704_v18 = vand.u32 4294901760, %v703_v33  ;;  %v711_v34 = vand.u32 4294901760, %v710_v0  ;;  %v5893_v35 = vpack.c.bf16 %v625_v29, %v622_v47 }
 0x14a   : > { %4489 = vmatprep.subr.bf16.mxu1 %v4488_v36  ;;  %v5895_v3 = vsub.f32 %v526_v9, %v622_v47  ;;  %v829_v59 = vsub.f32 %v5835_v51, %v6518_v8  ;;  %v836_v13 = vsub.f32 %v5844_v55, %v6516_v6  ;;  %v577_v44 = vand.u32 4294901760, %v511_v1 }
 0x14b   : > { %6570 = vst [vmem:[#allocation30_spill] sm:$0xff] %v5893_v35  ;;  %v4490_v52 = vpack.c.bf16 %v711_v34, %v704_v18  ;;  %4469 = vmatprep.subr.bf16.mxu0 %v5893_v35  ;;  %v5905_v11 = vsub.f32 %v527_v54, %v625_v29  ;;  %v6517_v57 = vand.u32 4294901760, %v5850_v61  ;;  %v6519_v36 = vand.u32 4294901760, %v5861_v56 }
 0x14c   : > { %v830_v9 = vand.u32 4294901760, %v829_v59  ;;  %v837_v33 = vand.u32 4294901760, %v836_v13  ;;  %v5909_v0 = vpack.c.bf16 %v577_v44, %v574_v24  ;;  %v5911_v47 = vsub.f32 %v510_v37, %v574_v24 }
 0x14d   : > { %4491 = vmatpush3.bf16.msra.mxu1 %v4490_v52  ;;  %v717_v6 = vsub.f32 %v5850_v61, %v6517_v57  ;;  %v724_v54 = vsub.f32 %v5861_v56, %v6519_v36  ;;  %v529_v34 = vcombine.high %v495_v41, %v495_v41  ;;  %v5919_v29 = vand.u32 4294901760, %v495_v41 }
 0x14e   : > { %6571 = vst [vmem:[#allocation31_spill] sm:$0xff] %v5909_v0  ;;  %v4492_v18 = vpack.c.bf16 %v837_v33, %v830_v9  ;;  %4471 = vmatpush3.bf16.msra.mxu0 %v5909_v0  ;;  %v6522_v59 = vand.u32 4294901760, %v5865_v10  ;;  %v6525_v37 = vand.u32 4294901760, %v5874_v2  ;;  %v4504_v52 = vpack.c.bf16 %v5735_v32, %v5733_v31 }
 0x14f   : > { %v718_v24 = vand.u32 4294901760, %v717_v6  ;;  %v725_v13 = vand.u32 4294901760, %v724_v54  ;;  %v5926_v57 = vand.u32 4294901760, %v529_v34  ;;  %v5929_v8 = vsub.f32 %v495_v41, %v5919_v29 }
 0x150   : > { %4493 = vmatprep.subr.bf16.mxu1 %v4492_v18  ;;  %v843_v9 = vsub.f32 %v5865_v10, %v6522_v59  ;;  %v850_v33 = vsub.f32 %v5874_v2, %v6525_v37  ;;  %4505 = vmatprep.subr.bf16.mxu0 %v4504_v52  ;;  %v6526_v36 = vand.u32 4294901760, %v5880_v53  ;;  %v6527_v6 = vand.u32 4294901760, %v5891_v19 }
 0x151   : > { %6572 = vst [vmem:[#allocation32_spill] sm:$0xff] %v5926_v57  ;;  %6573 = vst [vmem:[#allocation33_spill] sm:$0xff] %v5929_v8  ;;  %v5939_v54 = vsub.f32 %v511_v1, %v577_v44  ;;  %v4494_v0 = vpack.c.bf16 %v725_v13, %v718_v24  ;;  %v5942_v41 = vsub.f32 %v529_v34, %v5926_v57  ;;  %v6530_v18 = vand.u32 4294901760, %v5929_v8 }
 0x152   : > { %868 = vmatprep.mubr.f32.mxu1 %v5926_v57  ;;  %v844_v59 = vand.u32 4294901760, %v843_v9  ;;  %v851_v35 = vand.u32 4294901760, %v850_v33  ;;  %v731_v52 = vsub.f32 %v5880_v53, %v6526_v36  ;;  %v738_v37 = vsub.f32 %v5891_v19, %v6527_v6 }
 0x153   : > { %4495 = vmatpush3.bf16.msra.mxu1 %v4494_v0  ;;  %v629_v44 = vand.u32 4294901760, %v5942_v41  ;;  %v636_v1 = vsub.f32 %v5929_v8, %v6530_v18  ;;  %v6535_v34 = vand.u32 4294901760, %v5895_v3  ;;  %v863_v24 = vand.u32 4294901760, %v5905_v11 }
 0x154   : > { %v4496_v13 = vpack.c.bf16 %v851_v35, %v844_v59  ;;  %v732_v9 = vand.u32 4294901760, %v731_v52  ;;  %v739_v33 = vand.u32 4294901760, %v738_v37  ;;  %v6536_v8 = vand.u32 4294901760, %v5911_v47 }
 0x155   : > { %v630_v36 = vsub.f32 %v5942_v41, %v629_v44  ;;  %v857_v6 = vsub.f32 %v5895_v3, %v6535_v34  ;;  %v864_v0 = vsub.f32 %v5905_v11, %v863_v24  ;;  %v637_v57 = vand.u32 4294901760, %v636_v1 }
 0x156   : > { %4497 = vmatprep.subr.bf16.mxu1 %v4496_v13  ;;  %v4498_v18 = vpack.c.bf16 %v739_v33, %v732_v9  ;;  %v751_v7 = vand.u32 4294901760, %v5939_v54  ;;  %v4506_v59 = vpack.c.bf16 %v5719_v21, %v5715_v15  ;;  %v4508_v34 = vpack.c.bf16 %v5726_v26, %v5724_v25 }
 0x157   : > { %v631_v35 = vand.u32 4294901760, %v630_v36  ;;  %v858_v37 = vand.u32 4294901760, %v857_v6  ;;  %v865_v52 = vand.u32 4294901760, %v864_v0  ;;  %v745_v13 = vsub.f32 %v5911_v47, %v6536_v8 }
 0x158   : > { %4499 = vmatpush3.bf16.msra.mxu1 %v4498_v18  ;;  %v752_v1 = vsub.f32 %v5939_v54, %v751_v7  ;;  %v4510_v6 = vpack.c.bf16 %v5740_v38, %v5730_v28  ;;  %v4512_v18 = vpack.c.bf16 %v5747_v43, %v5744_v40  ;;  %v4514_v8 = vpack.c.bf16 %v5770_v58, %v5752_v46 }
 0x159   : > { %632 = vmatprep.mubr.f32.mxu0 %v631_v35  ;;  %v4500_v9 = vpack.c.bf16 %v865_v52, %v858_v37  ;;  %v746_v36 = vand.u32 4294901760, %v745_v13  ;;  %v6574_v35 = vand.u32 4294901760, %v5733_v31  ;;  %v6577_v52 = vand.u32 4294901760, %v5719_v21 }
 0x15a   : > { %638 = vmatmul.mubr.f32.vlgmr.msra.gmra.mrb[0].mxu0 %v637_v57  ;;  %v753_v33 = vand.u32 4294901760, %v752_v1  ;;  %v6575_v57 = vand.u32 4294901760, %v5735_v32  ;;  %v6578_v1 = vand.u32 4294901760, %v5724_v25  ;;  %v6582_v31 = vand.u32 4294901760, %v5744_v40 }
 0x15b   : > { %4507 = vmatpush3.bf16.msra.mxu0 %v4506_v59  ;;  %4501 = vmatprep.subr.bf16.mxu1 %v4500_v9  ;;  %v6576_v59 = vand.u32 4294901760, %v5715_v15  ;;  %v6583_v32 = vand.u32 4294901760, %v5747_v43  ;;  %v6584_v15 = vand.u32 4294901760, %v5752_v46  ;;  %v6585_v21 = vand.u32 4294901760, %v5770_v58 }
 0x15c   : > { %4509 = vmatprep.subr.bf16.mxu0 %v4508_v34  ;;  %v4502_v0 = vpack.c.bf16 %v753_v33, %v746_v36  ;;  %1005 = vmatprep.mubr.f32.mxu0 %v5942_v41  ;;  %v4568_v37 = vpack.c.bf16 %v6575_v57, %v6574_v35  ;;  %v6579_v34 = vand.u32 4294901760, %v5726_v26  ;;  %v6580_v36 = vand.u32 4294901760, %v5730_v28 }
 0x15d   : > { %v4570_v13 = vpack.c.bf16 %v6577_v52, %v6576_v59  ;;  %v6581_v33 = vand.u32 4294901760, %v5740_v38  ;;  %v4576_v35 = vpack.c.bf16 %v6583_v32, %v6582_v31  ;;  %v4578_v57 = vpack.c.bf16 %v6585_v21, %v6584_v15 }
 0x15e   : > { %v4572_v9 = vpack.c.bf16 %v6579_v34, %v6578_v1  ;;  %4503 = vmatpush3.bf16.msra.mxu1 %v4502_v0  ;;  %v6586_v25 = vand.u32 4294901760, %v5774_v63  ;;  %v6587_v26 = vand.u32 4294901760, %v5786_v12  ;;  %v6588_v28 = vand.u32 4294901760, %v5790_v17 }
 0x15f   : > { %v4574_v41 = vpack.c.bf16 %v6581_v33, %v6580_v36  ;;  %v6589_v38 = vand.u32 4294901760, %v5801_v42  ;;  %v6590_v40 = vand.u32 4294901760, %v5805_v50  ;;  %v6591_v43 = vand.u32 4294901760, %v5814_v60  ;;  %4511 = vmatpush3.bf16.msra.mxu0 %v4510_v6  ;;  %4537 = vmatprep.subr.bf16.mxu1 %v5713_v14 }
 0x160   : > { %v4580_v59 = vpack.c.bf16 %v6587_v26, %v6586_v25  ;;  %v6592_v46 = vand.u32 4294901760, %v5820_v5  ;;  %v6593_v58 = vand.u32 4294901760, %v5831_v30  ;;  %v6594_v34 = vand.u32 4294901760, %v5835_v51  ;;  %4513 = vmatprep.subr.bf16.mxu0 %v4512_v18 }
 0x161   : > { %v4582_v52 = vpack.c.bf16 %v6589_v38, %v6588_v28  ;;  %v4584_v0 = vpack.c.bf16 %v6591_v43, %v6590_v40  ;;  %v6595_v36 = vand.u32 4294901760, %v5844_v55  ;;  %v6596_v31 = vand.u32 4294901760, %v5850_v61  ;;  %870 = vmatmul.mubr.f32.vlgmr.msra.gmra.mrb[0].mxu1 %v5919_v29 }
 0x162   : > { %v4586_v1 = vpack.c.bf16 %v6593_v58, %v6592_v46  ;;  %v6597_v32 = vand.u32 4294901760, %v5861_v56  ;;  %v4516_v6 = vpack.c.bf16 %v5786_v12, %v5774_v63  ;;  %v6598_v21 = vand.u32 4294901760, %v5880_v53  ;;  %4539 = vmatpush3.bf16.msra.mxu1 %v5717_v20  ;;  %1112 = vmatprep.mubr.f32.mxu1 %v629_v44 }
 0x163   : > { %v4588_v33 = vpack.c.bf16 %v6595_v36, %v6594_v34  ;;  %v6599_v25 = vand.u32 4294901760, %v5891_v19  ;;  %4515 = vmatpush3.bf16.msra.mxu0 %v4514_v8  ;;  %4541 = vmatprep.subr.bf16.mxu1 %v5721_v22  ;;  %v4518_v18 = vpack.c.bf16 %v5801_v42, %v5790_v17  ;;  %v4520_v63 = vpack.c.bf16 %v5814_v60, %v5805_v50 }
 0x164   : > { %v6033_v15 = vpack.c.bf16 %v6597_v32, %v6596_v31  ;;  %4517 = vmatprep.subr.bf16.mxu0 %v4516_v6  ;;  %v4522_v12 = vpack.c.bf16 %v5831_v30, %v5820_v5  ;;  %v4524_v8 = vpack.c.bf16 %v5844_v55, %v5835_v51  ;;  %v4526_v17 = vpack.c.bf16 %v5861_v56, %v5850_v61  ;;  %v6600_v5 = vld [vmem:[#allocation28_spill] sm:$0xff]  ;;  %v6602_v30 = vld [vmem:[#allocation29_spill] sm:$0xff]  ;;  %v6603_v51 = vld [vmem:[#allocation30_spill] sm:$0xff] }
 0x165   : > { %v6041_v26 = vpack.c.bf16 %v6599_v25, %v6598_v21  ;;  %v4528_v42 = vpack.c.bf16 %v5874_v2, %v5865_v10  ;;  %v4530_v50 = vpack.c.bf16 %v5891_v19, %v5880_v53  ;;  %v4532_v60 = vpack.c.bf16 %v5905_v11, %v5895_v3  ;;  %v6601_v53 = vld [vmem:[#allocation33_spill] sm:$0xff]  ;;  %v6604_v55 = vld [vmem:[#allocation32_spill] sm:$0xff]  ;;  %v6605_v56 = vld [vmem:[#allocation31_spill] sm:$0xff] }
 0x166   : > { %4543 = vmatpush3.bf16.msra.mxu1 %v5728_v27  ;;  %v4534_v61 = vpack.c.bf16 %v5939_v54, %v5911_v47  ;;  %v6606_v19 = vand.u32 4294901760, %v6601_v53  ;;  %vm1862_vm3 = vcmask 64512   ;;  %vm2788_vm4 = vcmask 261120  }
 0x167   : > { %4519 = vmatpush3.bf16.msra.mxu0 %v4518_v18  ;;  %4545 = vmatprep.subr.bf16.mxu1 %v5742_v39 }
 0x168   : > { %4521 = vmatprep.subr.bf16.mxu0 %v4520_v63 }
 0x16a   : > { %4547 = vmatpush3.bf16.msra.mxu1 %v5750_v45 }
 0x16b   : > { %4523 = vmatpush3.bf16.msra.mxu0 %v4522_v12  ;;  %4549 = vmatprep.subr.bf16.mxu1 %v5772_v62  ;;  %v1855_v12 = vld [vmem:[#allocation13] sm:$0xf] }
 0x16c   : > { %4525 = vmatprep.subr.bf16.mxu0 %v4524_v8  ;;  %v2318_v8 = vld [vmem:[#allocation16] sm:$0xf] }
 0x16e   : > { %4551 = vmatpush3.bf16.msra.mxu1 %v5788_v16 }
 0x16f   : > { %4527 = vmatpush3.bf16.msra.mxu0 %v4526_v17  ;;  %4553 = vmatprep.subr.bf16.mxu1 %v5803_v49  ;;  %v1864_v17 = vsel %vm1862_vm3, %v1855_v12, 0 }
 0x170   : > { %4529 = vmatprep.subr.bf16.mxu0 %v4528_v42  ;;  %v2326_v42 = vsel %vm1862_vm3, %v2318_v8, 0 }
 0x172   : > { %4555 = vmatpush3.bf16.msra.mxu1 %v5818_v4 }
 0x173   : > { %4531 = vmatpush3.bf16.msra.mxu0 %v4530_v50  ;;  %4557 = vmatprep.subr.bf16.mxu1 %v5833_v48  ;;  %v6138_v50 = vand.u32 4294901760, %v1864_v17 }
 0x174   : > { %4533 = vmatprep.subr.bf16.mxu0 %v4532_v60  ;;  %v2394_v60 = vand.u32 4294901760, %v2326_v42 }
 0x176   : > { %4559 = vmatpush3.bf16.msra.mxu1 %v5848_v23 }
 0x177   : > { %4535 = vmatpush3.bf16.msra.mxu0 %v4534_v61  ;;  %4561 = vmatprep.subr.bf16.mxu1 %v6600_v5  ;;  %v1933_v61 = vsub.f32 %v1864_v17, %v6138_v50 }
 0x178   : > { %4569 = vmatprep.subr.bf16.mxu0 %v4568_v37 }
 0x17a   : > { %1008 = vmatmul.mubr.f32.vlgmr.msra.gmra.mrb[2].mxu0 %v6601_v53  ;;  %4563 = vmatpush3.bf16.msra.mxu1 %v6602_v30 }
 0x17b   : > { %4571 = vmatpush3.bf16.msra.mxu0 %v4570_v13  ;;  %4565 = vmatprep.subr.bf16.mxu1 %v6603_v51 }
 0x17c   : > { %4573 = vmatprep.subr.bf16.mxu0 %v4572_v9  ;;  %1282 = vmatprep.mubr.f32.mxu0 %v6604_v55 }
 0x17e   : > { %4567 = vmatpush3.bf16.msra.mxu1 %v6605_v56 }
 0x17f   : > { %4575 = vmatpush3.bf16.msra.mxu0 %v4574_v41  ;;  %4601 = vmatprep.subr.bf16.mxu1 %v5713_v14  ;;  %v6607_v14 = vand.u32 4294901760, %v5865_v10  ;;  %v1394_v10 = vld [vmem:[#allocation11] sm:$0xff] }
 0x180   : > { %4577 = vmatprep.subr.bf16.mxu0 %v4576_v35  ;;  %v1393_v35 = vld [vmem:[#allocation10] sm:$0xff] }
 0x181   : > { %1116 = vmatmul.mubr.f32.vlgmr.msra.gmra.mrb[2].mxu1 %v6606_v19 }
 0x182   : > { %4603 = vmatpush3.bf16.msra.mxu1 %v5717_v20  ;;  %1386 = vmatprep.mubr.f32.mxu1 %v6604_v55  ;;  %v6608_v20 = vand.u32 4294901760, %v5874_v2 }
 0x183   : > { %4579 = vmatpush3.bf16.msra.mxu0 %v4578_v57  ;;  %4605 = vmatprep.subr.bf16.mxu1 %v5721_v22  ;;  %v6609_v22 = vand.u32 4294901760, %v5895_v3 }
 0x184   : > { %4581 = vmatprep.subr.bf16.mxu0 %v4580_v59  ;;  %v4592_v44 = vpack.c.bf16 %v6608_v20, %v6607_v14  ;;  %v1402_v59 = vsel %vm1400_vm1, %v1393_v35, 0 }
 0x186   : > { %4607 = vmatpush3.bf16.msra.mxu1 %v5728_v27  ;;  %v4596_v27 = vpack.c.bf16 %v863_v24, %v6609_v22 }
 0x187   : > { %4583 = vmatpush3.bf16.msra.mxu0 %v4582_v52  ;;  %4609 = vmatprep.subr.bf16.mxu1 %v5742_v39  ;;  %v6610_v39 = vand.u32 4294901760, %v5911_v47  ;;  %v1474_v52 = vand.u32 4294901760, %v1402_v59 }
 0x188   : > { %4585 = vmatprep.subr.bf16.mxu0 %v4584_v0 }
 0x189   : > { %v1475_v43 = vsub.f32 %v1402_v59, %v1474_v52 }
 0x18a   : > { %4611 = vmatpush3.bf16.msra.mxu1 %v5750_v45  ;;  %v4598_v45 = vpack.c.bf16 %v751_v7, %v6610_v39 }
 0x18b   : > { %4587 = vmatpush3.bf16.msra.mxu0 %v4586_v1  ;;  %4613 = vmatprep.subr.bf16.mxu1 %v5772_v62  ;;  %v6537_v62 = vmov 0.0   ;;  %v1476_v46 = vand.u32 4294901760, %v1475_v43 }
 0x18c   : > { %4589 = vmatprep.subr.bf16.mxu0 %v4588_v33 }
 0x18d   : > { %v1477_v34 = vsub.f32 %v1475_v43, %v1476_v46 }
 0x18e   : > { %4615 = vmatpush3.bf16.msra.mxu1 %v5788_v16  ;;  %v5322_v16 = vmov 0  }
 0x18f   : > { %4591 = vmatpush3.bf16.msra.mxu0 %v6033_v15  ;;  %4617 = vmatprep.subr.bf16.mxu1 %v5803_v49  ;;  %v1856_v49 = vld [vmem:[#allocation14] sm:$0xf]  ;;  %v1478_v31 = vand.u32 4294901760, %v1477_v34 }
 0x190   : > { %4593 = vmatprep.subr.bf16.mxu0 %v4592_v44  ;;  %4924 = vset.pattern.permute.xlu0 %v5322_v16 }
 0x191   : > { %4925 = vset.pattern.permute.xlu1 %v5322_v16  ;;  %1397 = vperm.xlu0 %4924, %v1394_v10  }
 0x192   : > { %4619 = vmatpush3.bf16.msra.mxu1 %v5818_v4 }
 0x193   : > { %4595 = vmatpush3.bf16.msra.mxu0 %v6041_v26  ;;  %4621 = vmatprep.subr.bf16.mxu1 %v5833_v48  ;;  %v2319_v26 = vld [vmem:[#allocation17] sm:$0xf] }
 0x194   : > { %4597 = vmatprep.subr.bf16.mxu0 %v4596_v27  ;;  %2322 = vperm.xlu1 %4925, %v2319_v26  }
 0x195   : > { %1859 = vperm.xlu0 %4924, %v1856_v49  }
 0x196   : > { %4623 = vmatpush3.bf16.msra.mxu1 %v5848_v23 }
 0x197   : > { %4599 = vmatpush3.bf16.msra.mxu0 %v4598_v45  ;;  %4625 = vmatprep.subr.bf16.mxu1 %v6600_v5  ;;  %v2395_v5 = vsub.f32 %v2326_v42, %v2394_v60 }
 0x198   : > { %4355 = vmatprep.subr.mxu0 %v6537_v62 }
 0x19a   : > { %1284 = vmatmul.mubr.f32.vlgmr.msra.gmra.mrb[4].mxu0 %v5919_v29  ;;  %4627 = vmatpush3.bf16.msra.mxu1 %v6602_v30  ;;  %v1934_v30 = vand.u32 4294901760, %v1933_v61 }
 0x19b   : > { %4629 = vmatprep.subr.bf16.mxu1 %v6603_v51  ;;  %4357 = vmatprep.mubr.msk.f32.mxu0 %vm5321_vm0, %v6537_v62  ;;  %v2396_v51 = vand.u32 4294901760, %v2395_v5 }
 0x19c   : > { %v1935_v19 = vsub.f32 %v1933_v61, %v1934_v30 }
 0x19d   : > { %v2397_v14 = vsub.f32 %v2395_v5, %v2396_v51 }
 0x19e   : > { %4631 = vmatpush3.bf16.msra.mxu1 %v6605_v56  ;;  %v1936_v27 = vand.u32 4294901760, %v1935_v19  ;;  %v2782_v19 = vld [vmem:[#allocation7 + $0x10] sm:$0xff] }
 0x19f   : > { %4350 = vmatprep.subr.mxu1 %v6537_v62  ;;  %v2398_v39 = vand.u32 4294901760, %v2397_v14 }
 0x1a1   : > { %1388 = vmatmul.mubr.f32.vlgmr.msra.gmra.mrb[4].mxu1 %v5919_v29 }
 0x1a2   : > { %4352 = vmatprep.mubr.msk.f32.mxu1 %vm5321_vm0, %v6537_v62 }
 0x210   : > { %v1398_v53 = vpop.permute.xlu0 %1397 }
 0x22d   : > { %v4136_v4 = vpop.f32.mrb[0].mxu0 }
 0x22e   : > { %v4137_v23 = vpop.f32.mrb[1].mxu0 }
 0x22f   : > { %v4138_v48 = vadd.f32 %v4137_v23, %v4136_v4  ;;  %v6176_v23 = vld [vmem:[#allocation8 + $0x8] sm:$0xff] }
 0x234   : > { %v4171_v7 = vpop.f32.mrb[0].mxu1 }
 0x235   : > { %v4172_v2 = vpop.f32.mrb[1].mxu1 }
 0x236   : > { %v4173_v3 = vadd.f32 %v4172_v2, %v4171_v7  ;;  %v3346_v7 = vand.u32 4294901760, %v6176_v23 }
 0x238   : > { %v872_v11 = vadd.f32 %v4173_v3, %v4138_v48  ;;  %v6178_v48 = vld [vmem:[#allocation8 + $0x18] sm:$0xff]  ;;  %v6182_v3 = vld [vmem:[#allocation8] sm:$0xff] }
 0x239   : > { %v3350_v2 = vand.u32 4294901760, %v6178_v48 }
 0x24d   : > { %v4206_v47 = vpop.f32.mrb[2].mxu0 }
 0x24e   : > { %v4207_v29 = vpop.f32.mrb[3].mxu0 }
 0x24f   : > { %v4208_v54 = vadd.f32 %v4207_v29, %v4206_v47  ;;  %v3348_v47 = vand.u32 4294901760, %v6182_v3 }
 0x251   : > { %v1010_v24 = vadd.f32 %v4208_v54, %v872_v11  ;;  %v6184_v11 = vld [vmem:[#allocation8 + $0x10] sm:$0xff]  ;;  %v6191_v54 = vsub.f32 %v6176_v23, %v3346_v7 }
 0x252   : > { %v3352_v29 = vand.u32 4294901760, %v6184_v11 }
 0x253   : > { %v3432_v35 = vand.u32 4294901760, %v6191_v54 }
 0x254   : > { %v4241_v37 = vpop.f32.mrb[2].mxu1 }
 0x255   : > { %v4242_v13 = vpop.f32.mrb[3].mxu1 }
 0x256   : > { %v4243_v9 = vadd.f32 %v4242_v13, %v4241_v37  ;;  %v6201_v37 = vsub.f32 %v6182_v3, %v3348_v47  ;;  %v6206_v13 = vsub.f32 %v6184_v11, %v3352_v29 }
 0x258   : > { %v1118_v41 = vadd.f32 %v4243_v9, %v1010_v24  ;;  %v6196_v24 = vsub.f32 %v6178_v48, %v3350_v2  ;;  %v6208_v9 = vld [vmem:[#allocation8 + $0x28] sm:$0xff] }
 0x259   : > { %v3354_v59 = vand.u32 4294901760, %v6208_v9 }
 0x25b   : > { %v6233_v34 = vsub.f32 %v6208_v9, %v3354_v59 }
 0x25d   : > { %v6542_v26 = vand.u32 4294901760, %v6233_v34 }
 0x26d   : > { %v4276_v57 = vpop.f32.mrb[4].mxu0 }
 0x26e   : > { %v4277_v28 = vpop.f32.mrb[5].mxu0 }
 0x26f   : > { %v4278_v38 = vadd.f32 %v4277_v28, %v4276_v57  ;;  %v3444_v57 = vand.u32 4294901760, %v6196_v24 }
 0x271   : > { %v1286_v40 = vadd.f32 %v4278_v38, %v1118_v41  ;;  %v6210_v41 = vld [vmem:[#allocation8 + $0x38] sm:$0xff]  ;;  %v6216_v38 = vld [vmem:[#allocation8 + $0x20] sm:$0xff] }
 0x272   : > { %v3358_v28 = vand.u32 4294901760, %v6210_v41 }
 0x274   : > { %v4311_v0 = vpop.f32.mrb[4].mxu1 }
 0x275   : > { %v4312_v58 = vpop.f32.mrb[5].mxu1 }
 0x276   : > { %v4313_v1 = vadd.f32 %v4312_v58, %v4311_v0  ;;  %v3356_v0 = vand.u32 4294901760, %v6216_v38  ;;  %v3433_v58 = vsub.f32 %v6191_v54, %v3432_v35 }
 0x278   : > { %v1390_v36 = vadd.f32 %v4313_v1, %v1286_v40  ;;  %v3438_v40 = vand.u32 4294901760, %v6201_v37  ;;  %v3445_v1 = vsub.f32 %v6196_v24, %v3444_v57 }
 0x27a   : > { %v1406_v33 = vsel %vm1404_vm2, %v1390_v36, 0  ;;  %v6238_v36 = vsub.f32 %v6210_v41, %v3358_v28 }
 0x27b   : > { %v1409_v32 = vand.u32 4294901760, %v1406_v33 }
 0x27d   : > { %v1486_v15 = vsub.f32 %v1406_v33, %v1409_v32  ;;  %4351 = vmatpush3.msra.mxu1 %v1409_v32  ;;  %v3439_v33 = vsub.f32 %v6201_v37, %v3438_v40 }
 0x27e   : > { %4353 = vmatmul.mubr.f32.vlgmr.msra.gmra.mrb[6].mxu1 %v1478_v31  ;;  %4380 = vmatprep.subr.mxu1 %v6537_v62 }
 0x27f   : > { %v1487_v6 = vand.u32 4294901760, %v1486_v15  ;;  %4382 = vmatprep.mubr.msk.f32.mxu1 %vm5321_vm0, %v6537_v62  ;;  %v3440_v12 = vand.u32 4294901760, %v3439_v33 }
 0x281   : > { %v1488_v21 = vsub.f32 %v1486_v15, %v1487_v6 }
 0x283   : > { %v1489_v25 = vand.u32 4294901760, %v1488_v21  ;;  %v3434_v21 = vand.u32 4294901760, %v3433_v58 }
 0x285   : > { %4356 = vmatpush3.msra.mxu0 %v1489_v25  ;;  %v3446_v25 = vand.u32 4294901760, %v3445_v1 }
 0x286   : > { %4358 = vmatmul.mubr.f32.vlgmr.msra.gmra.mrb[6].mxu0 %v1474_v52  ;;  %4360 = vmatprep.subr.mxu0 %v6537_v62 }
 0x287   : > { %4361 = vmatpush3.msra.mxu0 %v1486_v15  ;;  %4362 = vmatprep.mubr.msk.f32.mxu0 %vm5321_vm0, %v6537_v62 }
 0x288   : > { %4365 = vmatprep.subr.mxu0 %v6537_v62 }
 0x28e   : > { %4363 = vmatmul.mubr.f32.vlgmr.msra.gmra.mrb[6].mxu0 %v1475_v43  ;;  %v3450_v43 = vand.u32 4294901760, %v6206_v13 }
 0x28f   : > { %4366 = vmatpush3.msra.mxu0 %v1409_v32  ;;  %4367 = vmatprep.mubr.msk.f32.mxu0 %vm5321_vm0, %v6537_v62 }
 0x290   : > { %4370 = vmatprep.subr.mxu0 %v6537_v62  ;;  %v3451_v31 = vsub.f32 %v6206_v13, %v3450_v43 }
 0x292   : > { %v3452_v8 = vand.u32 4294901760, %v3451_v31  ;;  %v4696_v31 = vpack.c.bf16 %v6196_v24, %v6191_v54 }
 0x296   : > { %4368 = vmatmul.mubr.f32.vlgmr.msra.gmra.mrb[6].mxu0 %v1476_v46 }
 0x297   : > { %4371 = vmatpush3.msra.mxu0 %v1487_v6  ;;  %4372 = vmatprep.mubr.msk.f32.mxu0 %vm5321_vm0, %v6537_v62  ;;  %v2781_v6 = vld [vmem:[#allocation7 + $0x8] sm:$0xff] }
 0x298   : > { %4375 = vmatprep.subr.mxu0 %v6537_v62 }
 0x29e   : > { %4373 = vmatmul.mubr.f32.vlgmr.msra.gmra.mrb[6].mxu0 %v1474_v52 }
 0x29f   : > { %4376 = vmatpush3.msra.mxu0 %v1409_v32  ;;  %4377 = vmatprep.mubr.msk.f32.mxu0 %vm5321_vm0, %v6537_v62  ;;  %v6249_v32 = vsub.f32 %v6216_v38, %v3356_v0 }
 0x2a0   : > { %4410 = vmatprep.subr.mxu0 %v6537_v62 }
 0x2a1   : > { %v6540_v17 = vand.u32 4294901760, %v6249_v32  ;;  %v6613_v54 = vand.u32 4294901760, %v6249_v32 }
 0x2a6   : > { %4378 = vmatmul.mubr.f32.vlgmr.msra.gmra.mrb[6].mxu0 %v1474_v52  ;;  %v6218_v52 = vld [vmem:[#allocation8 + $0x30] sm:$0xff] }
 0x2a7   : > { %4412 = vmatprep.mubr.msk.f32.mxu0 %vm5321_vm0, %v6537_v62  ;;  %v3360_v46 = vand.u32 4294901760, %v6218_v52 }
 0x2a9   : > { %v6254_v15 = vsub.f32 %v6218_v52, %v3360_v46  ;;  %v6346_v3 = vpack.c.bf16 %v3360_v46, %v3356_v0  ;;  %v2323_v0 = vpop.permute.xlu1 %2322  ;;  %v1860_v46 = vpop.permute.xlu0 %1859 }
 0x2ab   : > { %v6539_v42 = vand.u32 4294901760, %v6254_v15  ;;  %v6614_v24 = vand.u32 4294901760, %v6254_v15 }
 0x351   : > { %v1480_v18 = vpop.f32.mrb[6].mxu1 }
 0x352   : > { %v4354_v63 = vpop.f32.mrb[7].mxu1  ;;  %v1481_v55 = vadd.f32 %v1480_v18, %v1398_v53  ;;  %v6541_v18 = vand.u32 4294901760, %v6238_v36  ;;  %v2792_v53 = vand.u32 4294901760, %v2781_v6 }
 0x353   : > { %v2783_v63 = vld [vmem:[#allocation7 + $0x18] sm:$0xff] }
 0x379   : > { %v1850_v56 = vpop.f32.mrb[6].mxu0 }
 0x37a   : > { %v4729_v20 = vadd.f32 %v1850_v56, %v1481_v55  ;;  %v4379_v44 = vpop.f32.mrb[7].mxu0  ;;  %v3475_v55 = vsub.f32 %v6254_v15, %v6539_v42  ;;  %v2796_v56 = vand.u32 4294901760, %v2783_v63  ;;  %v6334_v42 = vpack.c.bf16 %v3352_v29, %v3348_v47 }
 0x37b   : > { %v4712_v47 = vpack.c.bf16 %v3444_v57, %v3432_v35  ;;  %v4714_v29 = vpack.c.bf16 %v3450_v43, %v3438_v40  ;;  %v4718_v35 = vpack.c.bf16 %v6614_v24, %v6613_v54 }
 0x37c   : > { %v1854_v22 = vmax.f32 %v4729_v20, 0.0  ;;  %v6279_v58 = vsub.f32 %v2783_v63, %v2796_v56  ;;  %v2786_v63 = vld [vmem:[#allocation7 + $0x30] sm:$0xff] }
 0x37e   : > { %v1867_v45 = vand.u32 4294901760, %v1854_v22 }
 0x380   : > { %v1944_v10 = vsub.f32 %v1854_v22, %v1867_v45  ;;  %4381 = vmatpush3.msra.mxu1 %v1867_v45  ;;  %4411 = vmatpush3.msra.mxu0 %v1867_v45 }
 0x381   : > { %4383 = vmatmul.mubr.f32.vlgmr.msra.gmra.mrb[8].mxu1 %v1936_v27  ;;  %4413 = vmatmul.mubr.f32.vlgmr.msra.gmra.mrb[8].mxu0 %v2398_v39  ;;  %v3476_v27 = vand.u32 4294901760, %v3475_v55  ;;  %v6272_v39 = vpack.c.bf16 %v2796_v56, %v2792_v53 }
 0x382   : > { %v1945_v16 = vand.u32 4294901760, %v1944_v10  ;;  %4385 = vmatprep.subr.mxu1 %v6537_v62  ;;  %4415 = vmatprep.subr.mxu0 %v6537_v62 }
 0x383   : > { %4387 = vmatprep.mubr.msk.f32.mxu1 %vm5321_vm0, %v6537_v62  ;;  %4417 = vmatprep.mubr.msk.f32.mxu0 %vm5321_vm0, %v6537_v62 }
 0x384   : > { %v1946_v49 = vsub.f32 %v1944_v10, %v1945_v16 }
 0x386   : > { %v1947_v4 = vand.u32 4294901760, %v1946_v49 }
 0x388   : > { %4386 = vmatpush3.msra.mxu1 %v1947_v4  ;;  %4416 = vmatpush3.msra.mxu0 %v1947_v4  ;;  %v6277_v4 = vsub.f32 %v2781_v6, %v2792_v53 }
 0x389   : > { %4388 = vmatmul.mubr.f32.vlgmr.msra.gmra.mrb[8].mxu1 %v6138_v50  ;;  %4390 = vmatprep.subr.mxu1 %v6537_v62 }
 0x38a   : > { %4418 = vmatmul.mubr.f32.vlgmr.msra.gmra.mrb[8].mxu0 %v2394_v60  ;;  %4420 = vmatprep.subr.mxu0 %v6537_v62  ;;  %v4648_v11 = vpack.c.bf16 %v6279_v58, %v6277_v4 }
 0x38b   : > { %4391 = vmatpush3.msra.mxu1 %v1944_v10  ;;  %4421 = vmatpush3.msra.mxu0 %v1944_v10  ;;  %v2798_v10 = vand.u32 4294901760, %v2782_v19 }
 0x38c   : > { %4392 = vmatprep.mubr.msk.f32.mxu1 %vm5321_vm0, %v6537_v62  ;;  %4395 = vmatprep.subr.mxu1 %v6537_v62 }
 0x38d   : > { %4422 = vmatprep.mubr.msk.f32.mxu0 %vm5321_vm0, %v6537_v62  ;;  %4425 = vmatprep.subr.mxu0 %v6537_v62  ;;  %v6283_v33 = vsub.f32 %v2782_v19, %v2798_v10 }
 0x391   : > { %4393 = vmatmul.mubr.f32.vlgmr.msra.gmra.mrb[8].mxu1 %v1933_v61  ;;  %v3457_v61 = vsub.f32 %v6233_v34, %v6542_v26 }
 0x392   : > { %4396 = vmatpush3.msra.mxu1 %v1867_v45  ;;  %4423 = vmatmul.mubr.f32.vlgmr.msra.gmra.mrb[8].mxu0 %v2395_v5  ;;  %v3469_v5 = vsub.f32 %v6238_v36, %v6541_v18 }
 0x393   : > { %4426 = vmatpush3.msra.mxu0 %v1867_v45  ;;  %4397 = vmatprep.mubr.msk.f32.mxu1 %vm5321_vm0, %v6537_v62  ;;  %v3458_v14 = vand.u32 4294901760, %v3457_v61 }
 0x394   : > { %4400 = vmatprep.subr.mxu1 %v6537_v62  ;;  %4427 = vmatprep.mubr.msk.f32.mxu0 %vm5321_vm0, %v6537_v62  ;;  %v3470_v20 = vand.u32 4294901760, %v3469_v5  ;;  %v2806_v5 = vand.u32 4294901760, %v2786_v63 }
 0x395   : > { %4430 = vmatprep.subr.mxu0 %v6537_v62 }
 0x399   : > { %4398 = vmatmul.mubr.f32.vlgmr.msra.gmra.mrb[8].mxu1 %v1934_v30  ;;  %v4690_v30 = vpack.c.bf16 %v3452_v8, %v3440_v12 }
 0x39a   : > { %4401 = vmatpush3.msra.mxu1 %v1945_v16  ;;  %4428 = vmatmul.mubr.f32.vlgmr.msra.gmra.mrb[8].mxu0 %v2396_v51  ;;  %v3463_v51 = vsub.f32 %v6249_v32, %v6540_v17 }
 0x39b   : > { %4431 = vmatpush3.msra.mxu0 %v1945_v16  ;;  %4402 = vmatprep.mubr.msk.f32.mxu1 %vm5321_vm0, %v6537_v62 }
 0x39c   : > { %4405 = vmatprep.subr.mxu1 %v6537_v62  ;;  %4432 = vmatprep.mubr.msk.f32.mxu0 %vm5321_vm0, %v6537_v62  ;;  %v3464_v22 = vand.u32 4294901760, %v3463_v51 }
 0x39d   : > { %4435 = vmatprep.subr.mxu0 %v6537_v62 }
 0x39e   : > { %v4694_v49 = vpack.c.bf16 %v3476_v27, %v3464_v22 }
 0x3a1   : > { %4403 = vmatmul.mubr.f32.vlgmr.msra.gmra.mrb[8].mxu1 %v6138_v50 }
 0x3a2   : > { %4406 = vmatpush3.msra.mxu1 %v1867_v45  ;;  %4433 = vmatmul.mubr.f32.vlgmr.msra.gmra.mrb[8].mxu0 %v2394_v60 }
 0x3a3   : > { %4436 = vmatpush3.msra.mxu0 %v1867_v45  ;;  %4407 = vmatprep.mubr.msk.f32.mxu1 %vm5321_vm0, %v6537_v62  ;;  %v4692_v45 = vpack.c.bf16 %v3470_v20, %v3458_v14 }
 0x3a4   : > { %4437 = vmatprep.mubr.msk.f32.mxu0 %vm5321_vm0, %v6537_v62  ;;  %4633 = vmatprep.subr.bf16.mxu1 %v6272_v39 }
 0x3a9   : > { %4408 = vmatmul.mubr.f32.vlgmr.msra.gmra.mrb[8].mxu1 %v6138_v50  ;;  %v2780_v50 = vld [vmem:[#allocation7] sm:$0xff] }
 0x3aa   : > { %4438 = vmatmul.mubr.f32.vlgmr.msra.gmra.mrb[8].mxu0 %v2394_v60  ;;  %2864 = vmatprep.mubr.f32.mxu1 %v6537_v62  ;;  %v4688_v60 = vpack.c.bf16 %v3446_v25, %v3434_v21  ;;  %v2794_v44 = vand.u32 4294901760, %v2780_v50  ;;  %v2785_v21 = vld [vmem:[#allocation7 + $0x28] sm:$0xff]  ;;  %v2787_v25 = vld [vmem:[#allocation7 + $0x38] sm:$0xff] }
 0x3ab   : > { %3534 = vmatprep.mubr.f32.mxu0 %v6537_v62  ;;  %v2800_v6 = vand.u32 4294901760, %v2785_v21  ;;  %v2804_v8 = vand.u32 4294901760, %v2787_v25 }
 0x3ac   : > { %4689 = vmatprep.subr.bf16.mxu0 %v4688_v60  ;;  %v6274_v16 = vsub.f32 %v2780_v50, %v2794_v44  ;;  %v6281_v1 = vpack.c.bf16 %v2798_v10, %v2794_v44  ;;  %v2784_v50 = vld [vmem:[#allocation7 + $0x20] sm:$0xff]  ;;  %v2878_v60 = vand.u32 4294901760, %v6277_v4  ;;  %v6306_v44 = vsub.f32 %v2786_v63, %v2806_v5 }
 0x3ad   : > { %4691 = vmatpush1.bf16.msra.mxu0 %v4690_v30  ;;  %v2802_v61 = vand.u32 4294901760, %v2784_v50  ;;  %v2890_v30 = vand.u32 4294901760, %v6279_v58  ;;  %v6294_v51 = vpack.c.bf16 %v2804_v8, %v2800_v6  ;;  %v6296_v55 = vsub.f32 %v2785_v21, %v2800_v6 }
 0x3ae   : > { %4693 = vmatprep.subr.bf16.mxu0 %v4692_v45  ;;  %4635 = vmatpush1.bf16.msra.mxu1 %v6281_v1  ;;  %v6298_v56 = vsub.f32 %v2787_v25, %v2804_v8  ;;  %v2879_v22 = vsub.f32 %v6277_v4, %v2878_v60  ;;  %v2884_v45 = vand.u32 4294901760, %v6274_v16  ;;  %v2896_v10 = vand.u32 4294901760, %v6283_v33 }
 0x3af   : > { %v6302_v14 = vpack.c.bf16 %v2806_v5, %v2802_v61  ;;  %v6304_v20 = vsub.f32 %v2784_v50, %v2802_v61  ;;  %4637 = vmatprep.subr.bf16.mxu1 %v6294_v51  ;;  %v2891_v27 = vsub.f32 %v6279_v58, %v2890_v30  ;;  %v2920_v6 = vand.u32 4294901760, %v6306_v44 }
 0x3b0   : > { %v2914_v21 = vand.u32 4294901760, %v6298_v56  ;;  %v2885_v50 = vsub.f32 %v6274_v16, %v2884_v45  ;;  %v2897_v63 = vsub.f32 %v6283_v33, %v2896_v10  ;;  %v6325_v5 = vpack.c.bf16 %v3350_v2, %v3346_v7 }
 0x3b1   : > { %4695 = vmatpush1.bf16.msra.mxu0 %v4694_v49  ;;  %v2902_v49 = vand.u32 4294901760, %v6296_v55  ;;  %v2908_v25 = vand.u32 4294901760, %v6304_v20  ;;  %v2892_v8 = vand.u32 4294901760, %v2891_v27  ;;  %v2921_v53 = vsub.f32 %v6306_v44, %v2920_v6 }
 0x3b2   : > { %4697 = vmatprep.subr.bf16.mxu0 %v4696_v31  ;;  %4639 = vmatpush1.bf16.msra.mxu1 %v6302_v14  ;;  %v2880_v31 = vand.u32 4294901760, %v2879_v22  ;;  %v2915_v22 = vsub.f32 %v6298_v56, %v2914_v21  ;;  %v2886_v27 = vand.u32 4294901760, %v2885_v50  ;;  %v2898_v12 = vand.u32 4294901760, %v2897_v63 }
 0x3b3   : > { %v2903_v61 = vsub.f32 %v6296_v55, %v2902_v49  ;;  %v2909_v19 = vsub.f32 %v6304_v20, %v2908_v25  ;;  %v2922_v7 = vand.u32 4294901760, %v2921_v53  ;;  %v4652_v9 = vpack.c.bf16 %v6298_v56, %v6296_v55 }
 0x3b4   : > { %v4640_v62 = vpack.c.bf16 %v2892_v8, %v2880_v31  ;;  %v2916_v17 = vand.u32 4294901760, %v2915_v22  ;;  %v4642_v2 = vpack.c.bf16 %v2898_v12, %v2886_v27  ;;  %v6340_v31 = vpack.c.bf16 %v3358_v28, %v3354_v59 }
 0x3b5   : > { %v2904_v23 = vand.u32 4294901760, %v2903_v61  ;;  %v2910_v48 = vand.u32 4294901760, %v2909_v19  ;;  %v4654_v41 = vpack.c.bf16 %v6306_v44, %v6304_v20  ;;  %v6611_v59 = vand.u32 4294901760, %v6233_v34  ;;  %v4935_v44 = vld [vmem:[%s5687_s23] sm:$0xff] }
 0x3b6   : > { %4641 = vmatprep.subr.bf16.mxu1 %v4640_v62  ;;  %v4650_v62 = vpack.c.bf16 %v6283_v33, %v6274_v16  ;;  %v6612_v28 = vand.u32 4294901760, %v6238_v36  ;;  %v6372_v57 = vpack.c.bf16 %v2890_v30, %v2878_v60  ;;  %v6374_v52 = vpack.c.bf16 %v2896_v10, %v2884_v45 }
 0x3b7   : > { %v4644_v18 = vpack.c.bf16 %v2916_v17, %v2904_v23  ;;  %v4646_v26 = vpack.c.bf16 %v2922_v7, %v2910_v48  ;;  %v6376_v40 = vpack.c.bf16 %v2914_v21, %v2902_v49  ;;  %v6378_v43 = vpack.c.bf16 %v2920_v6, %v2908_v25 }
 0x3b8   : > { %v4716_v38 = vpack.c.bf16 %v6612_v28, %v6611_v59  ;;  %v6615_v50 = vpack.c.bf16 %v6206_v13, %v6201_v37  ;;  %v6616_v63 = vmov 0.0   ;;  %v6617_v22 = vpack.c.bf16 %v6238_v36, %v6233_v34 }
 0x3b9   : > { %v6618_v23 = vpack.c.bf16 %v6254_v15, %v6249_v32 }
 0x47c   : > { %v2308_v17 = vpop.f32.mrb[8].mxu1 }
 0x47d   : > { %v4730_v16 = vadd.f32 %v2308_v17, %v1860_v46  ;;  %v2770_v4 = vpop.f32.mrb[8].mxu0  ;;  %v4409_v58 = vpop.f32.mrb[9].mxu1 }
 0x47e   : > { %v4731_v33 = vadd.f32 %v2770_v4, %v2323_v0  ;;  %v4439_v12 = vpop.f32.mrb[9].mxu0 }
 0x47f   : > { %v4095_v53 = vmul.f32 -1.442695, %v4730_v16 }
 0x480   : > { %v4096_v55 = vmul.f32 -1.442695, %v4731_v33 }
 0x481   : > { %4927 = vpow2.f32 %v4095_v53 }
 0x482   : > { %4929 = vpow2.f32 %v4096_v55 }
 0x48b   : > { %v4928_v60 = vpop.eup %4927 }
 0x48c   : > { %v4930_v30 = vpop.eup %4929  ;;  %v2315_v56 = vadd.f32 1.0, %v4928_v60 }
 0x48d   : > { %v2777_v19 = vadd.f32 1.0, %v4930_v30 }
 0x48e   : > { %4931 = vrcp.f32 %v2315_v56 }
 0x48f   : > { %4933 = vrcp.f32 %v2777_v19 }
 0x498   : > { %v4932_v45 = vpop.eup %4931 }
 0x499   : > { %v4934_v10 = vpop.eup %4933  ;;  %v2790_v49 = vsel %vm2788_vm4, %v4932_v45, 0 }
 0x49a   : > { %v2865_v21 = vand.u32 4294901760, %v2790_v49  ;;  %v3344_v25 = vsel %vm2788_vm4, %v4934_v10, 0 }
 0x49b   : > { %v3419_v6 = vand.u32 4294901760, %v3344_v25 }
 0x49c   : > { %v2866_v8 = vsub.f32 %v2790_v49, %v2865_v21 }
 0x49d   : > { %3536 = vmatmul.mubr.f32.vlgmr.msra.gmra.mrb[10].mxu0 %v3419_v6  ;;  %v3420_v7 = vsub.f32 %v3344_v25, %v3419_v6 }
 0x49e   : > { %4699 = vmatpush1.bf16.msra.mxu0 %v6615_v50  ;;  %3622 = vmatprep.mubr.f32.mxu0 %v6616_v63  ;;  %v2867_v61 = vand.u32 4294901760, %v2866_v8 }
 0x49f   : > { %4701 = vmatprep.subr.bf16.mxu0 %v6617_v22  ;;  %v3421_v37 = vand.u32 4294901760, %v3420_v7 }
 0x4a0   : > { %v2868_v27 = vsub.f32 %v2866_v8, %v2867_v61 }
 0x4a1   : > { %v3422_v13 = vsub.f32 %v3420_v7, %v3421_v37 }
 0x4a2   : > { %4703 = vmatpush1.bf16.msra.mxu0 %v6618_v23  ;;  %v2869_v48 = vand.u32 4294901760, %v2868_v27 }
 0x4a3   : > { %4705 = vmatprep.subr.bf16.mxu0 %v6325_v5  ;;  %v3423_v34 = vand.u32 4294901760, %v3422_v13 }
 0x4a4   : > { %2870 = vmatmul.mubr.f32.vlgmr.msra.gmra.mrb[10].mxu1 %v2869_v48 }
 0x4a5   : > { %4643 = vmatpush1.bf16.msra.mxu1 %v4642_v2  ;;  %3625 = vmatmul.mubr.f32.vlgmr.msra.gmra.mrb[10].mxu0 %v3420_v7 }
 0x4a6   : > { %4707 = vmatpush1.bf16.msra.mxu0 %v6334_v42  ;;  %4645 = vmatprep.subr.bf16.mxu1 %v4644_v18 }
 0x4a7   : > { %4709 = vmatprep.subr.bf16.mxu0 %v6340_v31  ;;  %2980 = vmatprep.mubr.f32.mxu1 %v6616_v63 }
 0x4a8   : > { %3703 = vmatprep.mubr.f32.mxu0 %v6616_v63 }
 0x4a9   : > { %4647 = vmatpush1.bf16.msra.mxu1 %v4646_v26 }
 0x4aa   : > { %4711 = vmatpush1.bf16.msra.mxu0 %v6346_v3  ;;  %4649 = vmatprep.subr.bf16.mxu1 %v4648_v11 }
 0x4ab   : > { %4713 = vmatprep.subr.bf16.mxu0 %v4712_v47 }
 0x4ac   : > { %2982 = vmatmul.mubr.f32.vlgmr.msra.gmra.mrb[10].mxu1 %v2865_v21 }
 0x4ad   : > { %4651 = vmatpush1.bf16.msra.mxu1 %v4650_v62  ;;  %3707 = vmatmul.mubr.f32.vlgmr.msra.gmra.mrb[10].mxu0 %v3421_v37 }
 0x4ae   : > { %4715 = vmatpush1.bf16.msra.mxu0 %v4714_v29  ;;  %4653 = vmatprep.subr.bf16.mxu1 %v4652_v9 }
 0x4af   : > { %4717 = vmatprep.subr.bf16.mxu0 %v4716_v38  ;;  %3068 = vmatprep.mubr.f32.mxu1 %v6616_v63 }
 0x4b0   : > { %3801 = vmatprep.mubr.f32.mxu0 %v6616_v63 }
 0x4b1   : > { %4655 = vmatpush1.bf16.msra.mxu1 %v4654_v41 }
 0x4b2   : > { %4719 = vmatpush1.bf16.msra.mxu0 %v4718_v35  ;;  %4657 = vmatprep.subr.bf16.mxu1 %v6272_v39 }
 0x4b3   : > { %4721 = vmatprep.subr.bf16.mxu0 %v6325_v5 }
 0x4b4   : > { %3071 = vmatmul.mubr.f32.vlgmr.msra.gmra.mrb[10].mxu1 %v2866_v8 }
 0x4b5   : > { %4659 = vmatpush1.bf16.msra.mxu1 %v6281_v1  ;;  %3803 = vmatmul.mubr.f32.vlgmr.msra.gmra.mrb[10].mxu0 %v3419_v6 }
 0x4b6   : > { %4723 = vmatpush1.bf16.msra.mxu0 %v6334_v42  ;;  %4661 = vmatprep.subr.bf16.mxu1 %v6294_v51 }
 0x4b7   : > { %4725 = vmatprep.subr.bf16.mxu0 %v6340_v31  ;;  %3149 = vmatprep.mubr.f32.mxu1 %v6616_v63 }
 0x4b8   : > { %3881 = vmatprep.mubr.f32.mxu0 %v6616_v63 }
 0x4b9   : > { %4663 = vmatpush1.bf16.msra.mxu1 %v6302_v14 }
 0x4ba   : > { %4727 = vmatpush1.bf16.msra.mxu0 %v6346_v3  ;;  %4665 = vmatprep.subr.bf16.mxu1 %v6372_v57 }
 0x4bc   : > { %3153 = vmatmul.mubr.f32.vlgmr.msra.gmra.mrb[10].mxu1 %v2867_v61 }
 0x4bd   : > { %4667 = vmatpush1.bf16.msra.mxu1 %v6374_v52  ;;  %3883 = vmatmul.mubr.f32.vlgmr.msra.gmra.mrb[10].mxu0 %v3419_v6 }
 0x4be   : > { %4669 = vmatprep.subr.bf16.mxu1 %v6376_v40  ;;  %3247 = vmatprep.mubr.f32.mxu1 %v6616_v63 }
 0x4c1   : > { %4671 = vmatpush1.bf16.msra.mxu1 %v6378_v43 }
 0x4c2   : > { %4673 = vmatprep.subr.bf16.mxu1 %v6272_v39 }
 0x4c4   : > { %3249 = vmatmul.mubr.f32.vlgmr.msra.gmra.mrb[10].mxu1 %v2865_v21 }
 0x4c5   : > { %4675 = vmatpush1.bf16.msra.mxu1 %v6281_v1  ;;  %3327 = vmatprep.mubr.f32.mxu1 %v6616_v63 }
 0x4c6   : > { %4677 = vmatprep.subr.bf16.mxu1 %v6294_v51 }
 0x4c9   : > { %4679 = vmatpush1.bf16.msra.mxu1 %v6302_v14 }
 0x4ca   : > { %4681 = vmatprep.subr.bf16.mxu1 %v6325_v5 }
 0x4cc   : > { %3329 = vmatmul.mubr.f32.vlgmr.msra.gmra.mrb[10].mxu1 %v2865_v21 }
 0x4cd   : > { %4683 = vmatpush1.bf16.msra.mxu1 %v6334_v42  ;;  %3418 = vmatprep.mubr.f32.mxu1 %v6616_v63 }
 0x4ce   : > { %4685 = vmatprep.subr.bf16.mxu1 %v6340_v31 }
 0x4d1   : > { %4687 = vmatpush1.bf16.msra.mxu1 %v6346_v3 }
 0x4d4   : > { %3424 = vmatmul.mubr.f32.vlgmr.msra.gmra.mrb[12].mxu1 %v3423_v34 }
 0x590   : > { %v3884_v36 = vpop.f32.mrb[10].mxu0 }
 0x591   : > { %v3886_v32 = vpop.f32.mrb[11].mxu0 }
 0x59f   : > { %v3330_v15 = vpop.f32.mrb[10].mxu1 }
 0x5a0   : > { %v3332_v26 = vpop.f32.mrb[11].mxu1 }
 0x5a7   : > { %v3425_v18 = vpop.f32.mrb[12].mxu1 }
 0x5a8   : > { %v4732_v39 = vadd.f32 %v3884_v36, %v3425_v18  ;;  %v3427_v42 = vpop.f32.mrb[13].mxu1 }
 0x5a9   : > { %v4733_v1 = vadd.f32 %v3886_v32, %v3427_v42 }
 0x5aa   : > { %v3889_v51 = vmul.f32 %v4732_v39, %v3330_v15 }
 0x5ab   : > { %v3890_v14 = vmul.f32 %v4733_v1, %v3332_v26 }
 0x5ad   : > { %v3893_v20 = vcombine.low %v3889_v51, %v3890_v14 }
 0x5af   : > { %v3895_v5 = vmul.f32 %v4935_v44, %v3893_v20 }
 0x5b1   : > { %3896 = vst [vmem:[%s494_s28] sm:$0xff] %v3895_v5 }
 0x5b2   : > { %5231 = shalt.err (!%p5228_p8)
}
 0x5b3   : > { %s5232_s1 = scalar_lea.hbm %s6433_s30, 128  ;;  %s5236_s28 = scalar_lea.hbm %s6619_s12, 256 }
 0x5b4   : > { %p5233_p0 = scmp.ne.s32.totalorder %s6433_s30, %s5232_s1  ;;  %p5237_p7 = scmp.lt.u32.totalorder %s6433_s30, %s6619_s12 }
 0x5b5   : > { %p5238_p10 = scmp.lt.u32.totalorder %s5236_s28, %s5232_s1  ;;  %p5240_p11 = scmp.lt.u32.totalorder %s5232_s1, %s6433_s30 }
 0x5b6   : > { %p5234_p5 = pnand %p5233_p0, %p6620_p12 }
 0x5b7   : > { %p5239_p1 = por %p5238_p10, %p5237_p7 }
 0x5b8   : > { %p5235_p2 = pneg %p5234_p5 }
 0x5b9   : > { %p5241_p13 = por %p5240_p11, %p5239_p1 }
 0x5bb   : > { %p5242_p3 = pnand %p5241_p13, %p5235_p2 }
 0x5bd   : > { %5245 = shalt.err (!%p5242_p3)
}
 0x5be   : > { %4818 = dma.vmem_to_hbm [thread:$0]  (%p6620_p12), %s6435_s20, 128, %s6433_s30, %s3898_s29  }
 0x5bf PF: > { %s3924_s22 = sand.u32 1, %s5292_s13   ;;  %p6621_p6 = scmp.ne.s32.totalorder %s6554_s25, 0 }
 0x5c0   : > { %p6622_p9 = scmp.ge.s32.totalorder %s5304_s16, 2  ;;  %s3925_s19 = scalar_lea.sflag [#allocation4], %s3924_s22 }
 0x5c2   : > { %p4853_p4 = pnand %p6622_p9, %p6621_p6 }
 0x5c4   : > { %5287 = dma.done.wait (!%p4853_p4), %s3925_s19, 128  }
 0x5c5   : > { %5289 = vsyncadd (!%p4853_p4), %s3925_s19, 4294967168  ;;  %p28_p8 = scmp.ge.s32.totalorder %s5611_s21, 4   ;;  %s6623_s13 = smov %s5296_s14 }
 0x5c6   : > { %s6624_s14 = smov %s5300_s15  ;;  %s6625_s15 = smov %s5623_s18 }
 0x5c7   : > { %s6626_s16 = smov %s5611_s21  ;;  %30 = sbr.rel (!%p28_p8) target bundleno = 13 (0xd), region = 141 }
 0x5ce   :  { %3930 = vsyncpa [#allocation3], 1 }
 0x5cf   :  { %3932 = vsyncpa [#allocation3 + $0x1], 1 }
 0x5d0   :  { %3933 = vsyncpa [#allocation6], 1 }
 0x5d1   :  { %3934 = vsyncpa [#allocation9], 1 }
 0x5d2   :  { %3935 = vsyncpa [#allocation12], 1 }
 0x5d3   :  { %3936 = vsyncpa [#allocation15], 1 }
 0x5d4   :  { %3937 = vsyncpa [#allocation18], 1 }
 0x5d5   :  { %3938 = vsyncpa [#allocation4], 1 }
 0x5d6   :  { %3940 = vsyncpa [#allocation4 + $0x1], 1 }

</bundles_post_ra>
